<compile_context>
chip_gen: v7x
topology: tpu7x:2x2x1
jax: 0.10.0
libtpu: 0.0.40
codegen_flags: <defaults>
</compile_context>

<pallas_src>
import functools

import jax
import jax.numpy as jnp
from jax.experimental import pallas as pl
from jax.experimental.pallas import tpu as pltpu

HIDDEN = 200        # fc1 width, fixed by the module definition
HIDDEN_PAD = 256    # zero-padded to a full lane-group multiple


def _actor_kernel(xT_ref, w1T_ref, b1_ref, whT_ref, bh_ref, out_ref):
    """Forward pass for one batch tile; batch lives on the lane axis."""
    xT = xT_ref[...]                                          # (s_dim, tb)

    # fc1 + relu6 in transposed form: (HIDDEN_PAD, s_dim) @ (s_dim, tb).
    # Padded hidden rows have zero weights and zero bias -> relu6 -> zero.
    h = jnp.dot(w1T_ref[...], xT, preferred_element_type=jnp.float32)
    h = jnp.clip(h + b1_ref[...], 0.0, 6.0)                   # (HIDDEN_PAD, tb)

    # Fused [mean ; sigma] head: (2*a_dim, HIDDEN_PAD) @ (HIDDEN_PAD, tb).
    # Padded K columns of whT are zero, so padded h rows contribute nothing.
    z = jnp.dot(whT_ref[...], h, preferred_element_type=jnp.float32)
    z = z + bh_ref[...]                                       # (2*a_dim, tb)

    # Rows [0, a_dim) are mean rows: 2*tanh.  Rows [a_dim, 2*a_dim) are sigma
    # rows: numerically stable softplus + 1e-3.  Sublane mask, no slicing.
    a_dim = z.shape[0] // 2
    row = jax.lax.broadcasted_iota(jnp.int32, z.shape, 0)
    mean_part = 2.0 * jnp.tanh(z)
    sigma_part = jnp.maximum(z, 0.0) + jnp.log1p(jnp.exp(-jnp.abs(z))) + 0.001
    out_ref[...] = jnp.where(row < a_dim, mean_part, sigma_part)


def pack_params(params):
    """One-time packing: transpose to (out, in), pad hidden 200->256, fuse heads.

    Call this ONCE (outside the per-step hot path) and pass the result to
    actor_forward.
    """
    w1, b1, wm, bm, ws, bs = params
    s_dim = w1.shape[0]
    a_dim = wm.shape[1]
    a2 = 2 * a_dim
    w1T = jnp.zeros((HIDDEN_PAD, s_dim), jnp.float32).at[:HIDDEN, :].set(w1.T)
    b1c = jnp.zeros((HIDDEN_PAD, 1), jnp.float32).at[:HIDDEN, 0].set(b1)
    whT = jnp.zeros((a2, HIDDEN_PAD), jnp.float32)
    whT = whT.at[:a_dim, :HIDDEN].set(wm.T).at[a_dim:, :HIDDEN].set(ws.T)
    bhc = jnp.concatenate([bm, bs]).reshape(a2, 1).astype(jnp.float32)
    return w1T, b1c, whT, bhc


@functools.partial(jax.jit, static_argnames=("block_b",))
def actor_forward(x, w1T, b1c, whT, bhc, block_b=None):
    """x: (B, s_dim) float32; packed params from pack_params().

    Returns (mean, sigma), each (B, a_dim).
    """
    B, s_dim = x.shape
    a2 = whT.shape[0]
    a_dim = a2 // 2
    hid = w1T.shape[0]

    # Default: a single grid step covering the whole lane-padded batch
    # (best on v5e/v6e and on v7x for moderate B).  For very large batches a
    # caller may pass block_b (multiple of 128) to shard across v7x's two TCs.
    if block_b is None:
        block_b = max(128, pl.cdiv(B, 128) * 128)
    if block_b % 128 != 0:
        raise ValueError("block_b must be a multiple of 128 (batch is the lane axis)")
    n_blocks = pl.cdiv(B, block_b)
    Bp = n_blocks * block_b

    # Layout plumbing only: put the batch on the lane axis; padded columns are
    # zero and produce finite (discarded) outputs.
    xT = x.T
    if Bp != B:
        xT = jnp.pad(xT, ((0, 0), (0, Bp - B)))

    cost = pl.CostEstimate(
        flops=2 * Bp * (s_dim * hid + hid * a2),
        transcendentals=3 * Bp * a2,          # tanh + exp + log1p per packed elem
        bytes_accessed=4 * (s_dim * Bp + hid * s_dim + hid
                            + hid * a2 + a2 + a2 * Bp),
    )

    # Constant index_maps -> weights/biases are fetched once, never re-DMA'd.
    fixed = lambda shape: pl.BlockSpec(shape, lambda i: (0, 0))

    out = pl.pallas_call(
        _actor_kernel,
        out_shape=jax.ShapeDtypeStruct((a2, Bp), jnp.float32),
        grid_spec=pltpu.PrefetchScalarGridSpec(
            num_scalar_prefetch=0,
            grid=(n_blocks,),
            in_specs=[
                pl.BlockSpec((s_dim, block_b), lambda i: (0, i)),  # x^T tile
                fixed((hid, s_dim)),                               # w1^T (padded)
                fixed((hid, 1)),                                   # b1 column (padded)
                fixed((a2, hid)),                                  # [wm ; ws]^T
                fixed((a2, 1)),                                    # [bm ; bs] column
            ],
            out_specs=pl.BlockSpec((a2, block_b), lambda i: (0, i)),
        ),
        compiler_params=pltpu.CompilerParams(
            dimension_semantics=("parallel",)),
        cost_estimate=cost,
    )(xT, w1T, b1c, whT, bhc)

    mean = out[:a_dim, :B].T
    sigma = out[a_dim:, :B].T
    return mean, sigma


def init_params(key, s_dim, a_dim):
    """Deterministic synthetic init, (in, out) layout (stands in for set_model_init)."""
    k1, k2, k3 = jax.random.split(key, 3)
    w1 = jax.random.normal(k1, (s_dim, HIDDEN), jnp.float32) * 0.1
    b1 = jnp.zeros((HIDDEN,), jnp.float32)
    wm = jax.random.normal(k2, (HIDDEN, a_dim), jnp.float32) * 0.1
    bm = jnp.zeros((a_dim,), jnp.float32)
    ws = jax.random.normal(k3, (HIDDEN, a_dim), jnp.float32) * 0.1
    bs = jnp.zeros((a_dim,), jnp.float32)
    return (w1, b1, wm, bm, ws, bs)


def actor_forward_ref(x, params):
    """Pure-JAX reference for correctness checking."""
    w1, b1, wm, bm, ws, bs = params
    h = jnp.clip(x @ w1 + b1, 0.0, 6.0)
    mean = 2.0 * jnp.tanh(h @ wm + bm)
    sigma = jax.nn.softplus(h @ ws + bs) + 0.001
    return mean, sigma


if __name__ == "__main__":
    B, S_DIM, A_DIM = 512, 16, 2

    key = jax.random.PRNGKey(0)
    kx, kp = jax.random.split(key)
    x = jax.random.normal(kx, (B, S_DIM), jnp.float32)
    params = init_params(kp, S_DIM, A_DIM)
    packed_params = pack_params(params)        # one-time, outside the hot path

    # Default block_b=None -> grid=(1,): right choice for all generations at
    # this batch size (single TC on v5e/v6e; 2-TC split not worth it on v7x).
    mean, sigma = actor_forward(x, *packed_params)
    jax.block_until_ready((mean, sigma))

    mean_ref, sigma_ref = actor_forward_ref(x, params)
    assert mean.shape == (B, A_DIM) and sigma.shape == (B, A_DIM)
    assert jnp.allclose(mean, mean_ref, atol=1e-5, rtol=1e-5)
    assert jnp.allclose(sigma, sigma_ref, atol=1e-5, rtol=1e-5)
    assert bool(jnp.all(sigma > 0.0))

    print("KERNEL_OK")
</pallas_src>

<mosaic_0001>
module attributes {stable_mosaic.version = 11 : i64} {
  func.func @_actor_kernel(%arg0: i32, %arg1: memref<16x512xf32, #tpu.memory_space<vmem>>, %arg2: memref<256x16xf32, #tpu.memory_space<vmem>>, %arg3: memref<256x1xf32, #tpu.memory_space<vmem>>, %arg4: memref<4x256xf32, #tpu.memory_space<vmem>>, %arg5: memref<4x1xf32, #tpu.memory_space<vmem>>, %arg6: memref<4x512xf32, #tpu.memory_space<vmem>>) attributes {dimension_semantics = [#tpu.dimension_semantics<parallel>], iteration_bounds = array<i64: 1>, scalar_prefetch = 0 : i64, scratch_operands = 0 : i64, tpu.core_type = #tpu.core_type<tc>, window_params = [{transform_indices = @transform_0, window_bounds = array<i64: 16, 512>}, {pipeline_mode = #tpu.pipeline_mode<synchronous>, transform_indices = @transform_1, window_bounds = array<i64: 256, 16>}, {pipeline_mode = #tpu.pipeline_mode<synchronous>, transform_indices = @transform_2, window_bounds = array<i64: 256, 1>}, {pipeline_mode = #tpu.pipeline_mode<synchronous>, transform_indices = @transform_3, window_bounds = array<i64: 4, 256>}, {pipeline_mode = #tpu.pipeline_mode<synchronous>, transform_indices = @transform_4, window_bounds = array<i64: 4, 1>}, {transform_indices = @transform_5, window_bounds = array<i64: 4, 512>}]} {
    %c0 = arith.constant 0 : index
    %c0_0 = arith.constant 0 : index
    %0 = vector.load %arg1[%c0, %c0_0] : memref<16x512xf32, #tpu.memory_space<vmem>>, vector<16x512xf32>
    %c0_1 = arith.constant 0 : index
    %c0_2 = arith.constant 0 : index
    %1 = vector.load %arg2[%c0_1, %c0_2] : memref<256x16xf32, #tpu.memory_space<vmem>>, vector<256x16xf32>
    %cst = arith.constant dense<0.000000e+00> : vector<256x512xf32>
    %2 = tpu.matmul %1, %0, %cst {dimension_numbers = #tpu.dot_dimension_numbers<[1], [0], [0], [1], [0, 0, 1, 1], [], []>} : vector<256x16xf32>, vector<16x512xf32>, vector<256x512xf32> -> vector<256x512xf32>
    %c0_3 = arith.constant 0 : index
    %c0_4 = arith.constant 0 : index
    %3 = vector.load %arg3[%c0_3, %c0_4] : memref<256x1xf32, #tpu.memory_space<vmem>>, vector<256x1xf32>
    %4 = vector.broadcast %3 : vector<256x1xf32> to vector<256x512xf32>
    %5 = arith.addf %2, %4 : vector<256x512xf32>
    %cst_5 = arith.constant 0.000000e+00 : f32
    %cst_6 = arith.constant 6.000000e+00 : f32
    %6 = vector.broadcast %cst_5 : f32 to vector<256x512xf32>
    %7 = arith.maximumf %6, %5 : vector<256x512xf32>
    %8 = vector.broadcast %cst_6 : f32 to vector<256x512xf32>
    %9 = arith.minimumf %8, %7 : vector<256x512xf32>
    %c0_7 = arith.constant 0 : index
    %c0_8 = arith.constant 0 : index
    %10 = vector.load %arg4[%c0_7, %c0_8] : memref<4x256xf32, #tpu.memory_space<vmem>>, vector<4x256xf32>
    %cst_9 = arith.constant dense<0.000000e+00> : vector<4x512xf32>
    %11 = tpu.matmul %10, %9, %cst_9 {dimension_numbers = #tpu.dot_dimension_numbers<[1], [0], [0], [1], [0, 0, 1, 1], [], []>} : vector<4x256xf32>, vector<256x512xf32>, vector<4x512xf32> -> vector<4x512xf32>
    %c0_10 = arith.constant 0 : index
    %c0_11 = arith.constant 0 : index
    %12 = vector.load %arg5[%c0_10, %c0_11] : memref<4x1xf32, #tpu.memory_space<vmem>>, vector<4x1xf32>
    %13 = vector.broadcast %12 : vector<4x1xf32> to vector<4x512xf32>
    %14 = arith.addf %11, %13 : vector<4x512xf32>
    %15 = tpu.iota {dimensions = array<i32: 0>} : vector<4x512xi32>
    %16 = math.tanh %14 : vector<4x512xf32>
    %cst_12 = arith.constant 2.000000e+00 : f32
    %17 = vector.broadcast %cst_12 : f32 to vector<4x512xf32>
    %18 = arith.mulf %17, %16 : vector<4x512xf32>
    %cst_13 = arith.constant 0.000000e+00 : f32
    %19 = vector.broadcast %cst_13 : f32 to vector<4x512xf32>
    %20 = arith.maximumf %14, %19 : vector<4x512xf32>
    %21 = math.absf %14 : vector<4x512xf32>
    %cst_14 = arith.constant 0.000000e+00 : f32
    %22 = vector.broadcast %cst_14 : f32 to vector<4x512xf32>
    %23 = arith.subf %22, %21 : vector<4x512xf32>
    %24 = math.exp %23 : vector<4x512xf32>
    %25 = math.log1p %24 : vector<4x512xf32>
    %26 = arith.addf %20, %25 : vector<4x512xf32>
    %cst_15 = arith.constant 1.000000e-03 : f32
    %27 = vector.broadcast %cst_15 : f32 to vector<4x512xf32>
    %28 = arith.addf %26, %27 : vector<4x512xf32>
    %c2_i32 = arith.constant 2 : i32
    %29 = vector.broadcast %c2_i32 : i32 to vector<4x512xi32>
    %30 = arith.cmpi slt, %15, %29 : vector<4x512xi32>
    %31 = arith.select %30, %18, %28 : vector<4x512xi1>, vector<4x512xf32>
    %c0_16 = arith.constant 0 : index
    %c0_17 = arith.constant 0 : index
    %32 = vector.load %arg6[%c0_16, %c0_17] : memref<4x512xf32, #tpu.memory_space<vmem>>, vector<4x512xf32>
    tpu.vector_store %arg6[%c0_16, %c0_17], %31 {strides = array<i32>} : memref<4x512xf32, #tpu.memory_space<vmem>>, vector<4x512xf32>,
    return
  }
  func.func @transform_0(%arg0: i32) -> (i32, i32) {
    %c0_i32 = arith.constant 0 : i32
    %c0_i32_0 = arith.constant 0 : i32
    return %c0_i32, %arg0 : i32, i32
  }
  func.func @transform_1(%arg0: i32) -> (i32, i32) {
    %c0_i32 = arith.constant 0 : i32
    %c0_i32_0 = arith.constant 0 : i32
    %c0_i32_1 = arith.constant 0 : i32
    return %c0_i32, %c0_i32_0 : i32, i32
  }
  func.func @transform_2(%arg0: i32) -> (i32, i32) {
    %c0_i32 = arith.constant 0 : i32
    %c0_i32_0 = arith.constant 0 : i32
    %c0_i32_1 = arith.constant 0 : i32
    return %c0_i32, %c0_i32_0 : i32, i32
  }
  func.func @transform_3(%arg0: i32) -> (i32, i32) {
    %c0_i32 = arith.constant 0 : i32
    %c0_i32_0 = arith.constant 0 : i32
    %c0_i32_1 = arith.constant 0 : i32
    return %c0_i32, %c0_i32_0 : i32, i32
  }
  func.func @transform_4(%arg0: i32) -> (i32, i32) {
    %c0_i32 = arith.constant 0 : i32
    %c0_i32_0 = arith.constant 0 : i32
    %c0_i32_1 = arith.constant 0 : i32
    return %c0_i32, %c0_i32_0 : i32, i32
  }
  func.func @transform_5(%arg0: i32) -> (i32, i32) {
    %c0_i32 = arith.constant 0 : i32
    %c0_i32_0 = arith.constant 0 : i32
    return %c0_i32, %arg0 : i32, i32
  }
}

</mosaic_0001>

<bundles_post_ra>
// kernel: actor_forward.1
= control target key start
LH: loop header
LB: loop body
LE: loop exit
PB: predicated region body
PF: predicated region fallthrough
CT: control target
= control target key end

     0   :  { %v1594_v3 = vmov 0.0   ;;  %v1595_v8 = vmov 0   ;;  %vm252_vm0 = vcmask 130048   ;;  %s2009_s0 = inlined_call_operand.vmem [shape: f32[16,512], index: 0, kind: input, shape index: {}]   ;;  %s2010_s1 = inlined_call_operand.vmem [shape: f32[256,16], index: 1, kind: input, shape index: {}]   ;;  %s2011_s2 = inlined_call_operand.vmem [shape: f32[256,1], index: 2, kind: input, shape index: {}]   ;;  %s2012_s4 = inlined_call_operand.vmem [shape: f32[4,1], index: 4, kind: input, shape index: {}]   ;;  %s2013_s3 = inlined_call_operand.vmem [shape: f32[4,256], index: 3, kind: input, shape index: {}]   ;;  %s2014_s5 = inlined_call_operand.vmem [shape: f32[4,512], index: 5, kind: output, shape index: {}]  }
   0x1   :  { %v21_v0 = vld [vmem:[%s2009_s0 + $0x8] sm:$0xff]  ;;  %v23_v2 = vld [vmem:[%s2009_s0 + $0x18] sm:$0xff]  ;;  %413 = vmatprep.mubr.f32.mxu0 %v1594_v3  ;;  %670 = vmatprep.mubr.f32.mxu1 %v1594_v3  ;;  %v20_v6 = vld [vmem:[%s2009_s0] sm:$0xff] }
   0x2   :  { %v25_v1 = vld [vmem:[%s2009_s0 + $0x28] sm:$0xff]  ;;  %v27_v5 = vld [vmem:[%s2009_s0 + $0x38] sm:$0xff]  ;;  %v24_v7 = vld [vmem:[%s2009_s0 + $0x20] sm:$0xff]  ;;  %1566 = vset.pattern.permute.xlu0 %v1595_v8  ;;  %1567 = vset.pattern.permute.xlu1 %v1595_v8 }
   0x3   :  { %v1428_v4 = vpack.c.bf16 %v25_v1, %v21_v0  ;;  %v1432_v9 = vpack.c.bf16 %v27_v5, %v23_v2  ;;  %v1430_v10 = vpack.c.bf16 %v24_v7, %v20_v6  ;;  %v22_v11 = vld [vmem:[%s2009_s0 + $0x10] sm:$0xff]  ;;  %v28_v14 = vld [vmem:[%s2010_s1] sm:$0xff]  ;;  %v61_v16 = vld [vmem:[%s2011_s2 + $0x8] sm:$0xff] }
   0x4   :  { %v26_v12 = vld [vmem:[%s2009_s0 + $0x30] sm:$0xff]  ;;  %v60_v15 = vld [vmem:[%s2011_s2] sm:$0xff]  ;;  %v29_v18 = vld [vmem:[%s2010_s1 + $0x8] sm:$0xff] }
   0x5   :  { %1429 = vmatprep.subr.bf16.mxu0 %v1428_v4  ;;  %v1434_v13 = vpack.c.bf16 %v26_v12, %v22_v11  ;;  %1433 = vmatprep.subr.bf16.mxu1 %v1432_v9  ;;  %v62_v17 = vld [vmem:[%s2011_s2 + $0x10] sm:$0xff]  ;;  %v63_v19 = vld [vmem:[%s2011_s2 + $0x18] sm:$0xff]  ;;  %v64_v20 = vld [vmem:[%s2011_s2 + $0x20] sm:$0xff] }
   0x6   :  { %1431 = vmatpush1.bf16.msra.mxu0 %v1430_v10  ;;  %94 = vperm.xlu0 %1566, %v60_v15   ;;  %v30_v21 = vld [vmem:[%s2010_s1 + $0x10] sm:$0xff]  ;;  %v65_v22 = vld [vmem:[%s2011_s2 + $0x28] sm:$0xff]  ;;  %v31_v24 = vld [vmem:[%s2010_s1 + $0x18] sm:$0xff] }
   0x7   :  { %1435 = vmatpush1.bf16.msra.mxu1 %v1434_v13  ;;  %104 = vperm.xlu1 %1567, %v62_v17   ;;  %v66_v23 = vld [vmem:[%s2011_s2 + $0x30] sm:$0xff]  ;;  %v67_v25 = vld [vmem:[%s2011_s2 + $0x38] sm:$0xff]  ;;  %v68_v26 = vld [vmem:[%s2011_s2 + $0x40] sm:$0xff] }
   0x8   :  { %v32_v27 = vld [vmem:[%s2010_s1 + $0x20] sm:$0xff]  ;;  %v69_v28 = vld [vmem:[%s2011_s2 + $0x48] sm:$0xff]  ;;  %v70_v29 = vld [vmem:[%s2011_s2 + $0x50] sm:$0xff] }
   0x9   :  { %1364 = vmatmul.mubr.msk.f32.vlgmr.msra.gmra.mrb[0].mxu0 %vm252_vm0, %v28_v14  ;;  %v33_v30 = vld [vmem:[%s2010_s1 + $0x28] sm:$0xff]  ;;  %v71_v31 = vld [vmem:[%s2011_s2 + $0x58] sm:$0xff]  ;;  %v72_v32 = vld [vmem:[%s2011_s2 + $0x60] sm:$0xff] }
   0xa   :  { %1396 = vmatmul.mubr.msk.f32.vlgmr.msra.gmra.mrb[0].mxu1 %vm252_vm0, %v28_v14  ;;  %419 = vmatprep.mubr.f32.mxu0 %v1594_v3  ;;  %v34_v33 = vld [vmem:[%s2010_s1 + $0x30] sm:$0xff]  ;;  %v73_v34 = vld [vmem:[%s2011_s2 + $0x68] sm:$0xff]  ;;  %v35_v36 = vld [vmem:[%s2010_s1 + $0x38] sm:$0xff] }
   0xb   :  { %676 = vmatprep.mubr.f32.mxu1 %v1594_v3  ;;  %99 = vperm.xlu0 %1566, %v61_v16   ;;  %v74_v35 = vld [vmem:[%s2011_s2 + $0x70] sm:$0xff]  ;;  %v75_v37 = vld [vmem:[%s2011_s2 + $0x78] sm:$0xff]  ;;  %v76_v38 = vld [vmem:[%s2011_s2 + $0x80] sm:$0xff] }
   0xc   :  { %109 = vperm.xlu1 %1567, %v63_v19   ;;  %v36_v39 = vld [vmem:[%s2010_s1 + $0x40] sm:$0xff]  ;;  %v77_v40 = vld [vmem:[%s2011_s2 + $0x88] sm:$0xff]  ;;  %v78_v41 = vld [vmem:[%s2011_s2 + $0x90] sm:$0xff] }
   0xd   :  { %1365 = vmatmul.mubr.msk.f32.gmra.mrb[2].mxu0 %vm252_vm0, %v29_v18  ;;  %v37_v42 = vld [vmem:[%s2010_s1 + $0x48] sm:$0xff]  ;;  %v79_v43 = vld [vmem:[%s2011_s2 + $0x98] sm:$0xff]  ;;  %v80_v44 = vld [vmem:[%s2011_s2 + $0xa0] sm:$0xff] }
   0xe   :  { %1397 = vmatmul.mubr.msk.f32.gmra.mrb[2].mxu1 %vm252_vm0, %v29_v18  ;;  %425 = vmatprep.mubr.f32.mxu0 %v1594_v3  ;;  %v38_v45 = vld [vmem:[%s2010_s1 + $0x50] sm:$0xff]  ;;  %v81_v46 = vld [vmem:[%s2011_s2 + $0xa8] sm:$0xff]  ;;  %v39_v48 = vld [vmem:[%s2010_s1 + $0x58] sm:$0xff] }
   0xf   :  { %682 = vmatprep.mubr.f32.mxu1 %v1594_v3  ;;  %114 = vperm.xlu0 %1566, %v64_v20   ;;  %v82_v47 = vld [vmem:[%s2011_s2 + $0xb0] sm:$0xff]  ;;  %v83_v49 = vld [vmem:[%s2011_s2 + $0xb8] sm:$0xff]  ;;  %v84_v50 = vld [vmem:[%s2011_s2 + $0xc0] sm:$0xff] }
  0x10   :  { %119 = vperm.xlu1 %1567, %v65_v22   ;;  %v40_v51 = vld [vmem:[%s2010_s1 + $0x60] sm:$0xff]  ;;  %v85_v52 = vld [vmem:[%s2011_s2 + $0xc8] sm:$0xff]  ;;  %v86_v53 = vld [vmem:[%s2011_s2 + $0xd0] sm:$0xff] }
  0x11   :  { %1366 = vmatmul.mubr.msk.f32.gmra.mrb[4].mxu0 %vm252_vm0, %v30_v21  ;;  %v41_v54 = vld [vmem:[%s2010_s1 + $0x68] sm:$0xff]  ;;  %v87_v55 = vld [vmem:[%s2011_s2 + $0xd8] sm:$0xff]  ;;  %v88_v56 = vld [vmem:[%s2011_s2 + $0xe0] sm:$0xff] }
  0x12   :  { %1398 = vmatmul.mubr.msk.f32.gmra.mrb[4].mxu1 %vm252_vm0, %v30_v21  ;;  %431 = vmatprep.mubr.f32.mxu0 %v1594_v3  ;;  %v42_v57 = vld [vmem:[%s2010_s1 + $0x70] sm:$0xff]  ;;  %v89_v58 = vld [vmem:[%s2011_s2 + $0xe8] sm:$0xff]  ;;  %v43_v60 = vld [vmem:[%s2010_s1 + $0x78] sm:$0xff] }
  0x13   :  { %688 = vmatprep.mubr.f32.mxu1 %v1594_v3  ;;  %124 = vperm.xlu0 %1566, %v66_v23   ;;  %v90_v59 = vld [vmem:[%s2011_s2 + $0xf0] sm:$0xff]  ;;  %v91_v61 = vld [vmem:[%s2011_s2 + $0xf8] sm:$0xff]  ;;  %v1120_v62 = vld [vmem:[%s2012_s4] sm:$0xf] }
  0x14   :  { %129 = vperm.xlu1 %1567, %v67_v25   ;;  %v44_v63 = vld [vmem:[%s2010_s1 + $0x80] sm:$0xff]  ;;  %v45_v0 = vld [vmem:[%s2010_s1 + $0x88] sm:$0xff]  ;;  %v46_v1 = vld [vmem:[%s2010_s1 + $0x90] sm:$0xff] }
  0x15   :  { %1367 = vmatmul.mubr.msk.f32.gmra.mrb[6].mxu0 %vm252_vm0, %v31_v24  ;;  %v47_v2 = vld [vmem:[%s2010_s1 + $0x98] sm:$0xff]  ;;  %v48_v4 = vld [vmem:[%s2010_s1 + $0xa0] sm:$0xff]  ;;  %v49_v5 = vld [vmem:[%s2010_s1 + $0xa8] sm:$0xff] }
  0x16   :  { %1399 = vmatmul.mubr.msk.f32.gmra.mrb[6].mxu1 %vm252_vm0, %v31_v24  ;;  %437 = vmatprep.mubr.f32.mxu0 %v1594_v3  ;;  %v50_v6 = vld [vmem:[%s2010_s1 + $0xb0] sm:$0xff]  ;;  %v51_v7 = vld [vmem:[%s2010_s1 + $0xb8] sm:$0xff]  ;;  %v52_v8 = vld [vmem:[%s2010_s1 + $0xc0] sm:$0xff] }
  0x17   :  { %694 = vmatprep.mubr.f32.mxu1 %v1594_v3  ;;  %134 = vperm.xlu0 %1566, %v68_v26   ;;  %v53_v9 = vld [vmem:[%s2010_s1 + $0xc8] sm:$0xff]  ;;  %v54_v10 = vld [vmem:[%s2010_s1 + $0xd0] sm:$0xff]  ;;  %v55_v11 = vld [vmem:[%s2010_s1 + $0xd8] sm:$0xff] }
  0x18   :  { %139 = vperm.xlu1 %1567, %v69_v28   ;;  %v56_v12 = vld [vmem:[%s2010_s1 + $0xe0] sm:$0xff]  ;;  %v57_v13 = vld [vmem:[%s2010_s1 + $0xe8] sm:$0xff]  ;;  %v58_v14 = vld [vmem:[%s2010_s1 + $0xf0] sm:$0xff] }
  0x19   :  { %1368 = vmatmul.mubr.msk.f32.gmra.mrb[8].mxu0 %vm252_vm0, %v32_v27  ;;  %v59_v15 = vld [vmem:[%s2010_s1 + $0xf8] sm:$0xff] }
  0x1a   :  { %1400 = vmatmul.mubr.msk.f32.gmra.mrb[8].mxu1 %vm252_vm0, %v32_v27  ;;  %443 = vmatprep.mubr.f32.mxu0 %v1594_v3 }
  0x1b   :  { %700 = vmatprep.mubr.f32.mxu1 %v1594_v3  ;;  %144 = vperm.xlu0 %1566, %v70_v29  }
  0x1c   :  { %149 = vperm.xlu1 %1567, %v71_v31  }
  0x1d   :  { %1369 = vmatmul.mubr.msk.f32.gmra.mrb[10].mxu0 %vm252_vm0, %v33_v30 }
  0x1e   :  { %1401 = vmatmul.mubr.msk.f32.gmra.mrb[10].mxu1 %vm252_vm0, %v33_v30  ;;  %449 = vmatprep.mubr.f32.mxu0 %v1594_v3 }
  0x1f   :  { %706 = vmatprep.mubr.f32.mxu1 %v1594_v3  ;;  %154 = vperm.xlu0 %1566, %v72_v32  }
  0x20   :  { %159 = vperm.xlu1 %1567, %v73_v34  }
  0x21   :  { %1370 = vmatmul.mubr.msk.f32.gmra.mrb[12].mxu0 %vm252_vm0, %v34_v33 }
  0x22   :  { %1402 = vmatmul.mubr.msk.f32.gmra.mrb[12].mxu1 %vm252_vm0, %v34_v33  ;;  %455 = vmatprep.mubr.f32.mxu0 %v1594_v3 }
  0x23   :  { %712 = vmatprep.mubr.f32.mxu1 %v1594_v3  ;;  %164 = vperm.xlu0 %1566, %v74_v35  }
  0x24   :  { %169 = vperm.xlu1 %1567, %v75_v37  }
  0x25   :  { %1371 = vmatmul.mubr.msk.f32.gmra.mrb[14].mxu0 %vm252_vm0, %v35_v36 }
  0x26   :  { %1403 = vmatmul.mubr.msk.f32.gmra.mrb[14].mxu1 %vm252_vm0, %v35_v36  ;;  %461 = vmatprep.mubr.f32.mxu0 %v1594_v3 }
  0x27   :  { %718 = vmatprep.mubr.f32.mxu1 %v1594_v3  ;;  %174 = vperm.xlu0 %1566, %v76_v38  }
  0x28   :  { %179 = vperm.xlu1 %1567, %v77_v40   ;;  %v1119_v40 = vld [vmem:[%s2013_s3] sm:$0xff] }
  0x29   :  { %1372 = vmatmul.mubr.msk.f32.gmra.mrb[16].mxu0 %vm252_vm0, %v36_v39 }
  0x2a   :  { %1404 = vmatmul.mubr.msk.f32.gmra.mrb[16].mxu1 %vm252_vm0, %v36_v39  ;;  %467 = vmatprep.mubr.f32.mxu0 %v1594_v3 }
  0x2b   :  { %724 = vmatprep.mubr.f32.mxu1 %v1594_v3  ;;  %184 = vperm.xlu0 %1566, %v78_v41  }
  0x2c   :  { %189 = vperm.xlu1 %1567, %v79_v43  }
  0x2d   :  { %1373 = vmatmul.mubr.msk.f32.gmra.mrb[18].mxu0 %vm252_vm0, %v37_v42 }
  0x2e   :  { %1405 = vmatmul.mubr.msk.f32.gmra.mrb[18].mxu1 %vm252_vm0, %v37_v42  ;;  %473 = vmatprep.mubr.f32.mxu0 %v1594_v3 }
  0x2f   :  { %730 = vmatprep.mubr.f32.mxu1 %v1594_v3  ;;  %194 = vperm.xlu0 %1566, %v80_v44  }
  0x30   :  { %199 = vperm.xlu1 %1567, %v81_v46  }
  0x31   :  { %1374 = vmatmul.mubr.msk.f32.gmra.mrb[20].mxu0 %vm252_vm0, %v38_v45 }
  0x32   :  { %1406 = vmatmul.mubr.msk.f32.gmra.mrb[20].mxu1 %vm252_vm0, %v38_v45  ;;  %479 = vmatprep.mubr.f32.mxu0 %v1594_v3  ;;  %v1127_v45 = vcombine.high %v1119_v40, %v1119_v40 }
  0x33   :  { %736 = vmatprep.mubr.f32.mxu1 %v1594_v3  ;;  %204 = vperm.xlu0 %1566, %v82_v47  }
  0x34   :  { %209 = vperm.xlu1 %1567, %v83_v49  }
  0x35   :  { %1375 = vmatmul.mubr.msk.f32.gmra.mrb[22].mxu0 %vm252_vm0, %v39_v48 }
  0x36   :  { %1407 = vmatmul.mubr.msk.f32.gmra.mrb[22].mxu1 %vm252_vm0, %v39_v48  ;;  %485 = vmatprep.mubr.f32.mxu0 %v1594_v3 }
  0x37   :  { %742 = vmatprep.mubr.f32.mxu1 %v1594_v3  ;;  %214 = vperm.xlu0 %1566, %v84_v50  }
  0x38   :  { %219 = vperm.xlu1 %1567, %v85_v52  }
  0x39   :  { %1376 = vmatmul.mubr.msk.f32.gmra.mrb[24].mxu0 %vm252_vm0, %v40_v51 }
  0x3a   :  { %1408 = vmatmul.mubr.msk.f32.gmra.mrb[24].mxu1 %vm252_vm0, %v40_v51  ;;  %491 = vmatprep.mubr.f32.mxu0 %v1594_v3 }
  0x3b   :  { %748 = vmatprep.mubr.f32.mxu1 %v1594_v3  ;;  %224 = vperm.xlu0 %1566, %v86_v53  }
  0x3c   :  { %229 = vperm.xlu1 %1567, %v87_v55  }
  0x3d   :  { %1377 = vmatmul.mubr.msk.f32.gmra.mrb[26].mxu0 %vm252_vm0, %v41_v54 }
  0x3e   :  { %1409 = vmatmul.mubr.msk.f32.gmra.mrb[26].mxu1 %vm252_vm0, %v41_v54  ;;  %497 = vmatprep.mubr.f32.mxu0 %v1594_v3 }
  0x3f   :  { %754 = vmatprep.mubr.f32.mxu1 %v1594_v3  ;;  %234 = vperm.xlu0 %1566, %v88_v56  }
  0x40   :  { %239 = vperm.xlu1 %1567, %v89_v58  }
  0x41   :  { %1378 = vmatmul.mubr.msk.f32.gmra.mrb[28].mxu0 %vm252_vm0, %v42_v57 }
  0x42   :  { %1410 = vmatmul.mubr.msk.f32.gmra.mrb[28].mxu1 %vm252_vm0, %v42_v57  ;;  %503 = vmatprep.mubr.f32.mxu0 %v1594_v3 }
  0x43   :  { %760 = vmatprep.mubr.f32.mxu1 %v1594_v3  ;;  %244 = vperm.xlu0 %1566, %v90_v59  }
  0x44   :  { %249 = vperm.xlu1 %1567, %v91_v61  }
  0x45   :  { %1379 = vmatmul.mubr.msk.f32.gmra.mrb[30].mxu0 %vm252_vm0, %v43_v60 }
  0x46   :  { %1411 = vmatmul.mubr.msk.f32.gmra.mrb[30].mxu1 %vm252_vm0, %v43_v60  ;;  %509 = vmatprep.mubr.f32.mxu0 %v1594_v3 }
  0x47   :  { %766 = vmatprep.mubr.f32.mxu1 %v1594_v3  ;;  %1123 = vperm.xlu0 %1566, %v1120_v62  }
  0x49   :  { %1380 = vmatmul.mubr.msk.f32.gmra.mrb[32].mxu0 %vm252_vm0, %v44_v63 }
  0x4a   :  { %1412 = vmatmul.mubr.msk.f32.gmra.mrb[32].mxu1 %vm252_vm0, %v44_v63  ;;  %515 = vmatprep.mubr.f32.mxu0 %v1594_v3 }
  0x4b   :  { %772 = vmatprep.mubr.f32.mxu1 %v1594_v3 }
  0x4d   :  { %1381 = vmatmul.mubr.msk.f32.gmra.mrb[34].mxu0 %vm252_vm0, %v45_v0 }
  0x4e   :  { %1413 = vmatmul.mubr.msk.f32.gmra.mrb[34].mxu1 %vm252_vm0, %v45_v0  ;;  %521 = vmatprep.mubr.f32.mxu0 %v1594_v3 }
  0x4f   :  { %778 = vmatprep.mubr.f32.mxu1 %v1594_v3 }
  0x51   :  { %1382 = vmatmul.mubr.msk.f32.gmra.mrb[36].mxu0 %vm252_vm0, %v46_v1 }
  0x52   :  { %1414 = vmatmul.mubr.msk.f32.gmra.mrb[36].mxu1 %vm252_vm0, %v46_v1  ;;  %527 = vmatprep.mubr.f32.mxu0 %v1594_v3 }
  0x53   :  { %784 = vmatprep.mubr.f32.mxu1 %v1594_v3 }
  0x55   :  { %1383 = vmatmul.mubr.msk.f32.gmra.mrb[38].mxu0 %vm252_vm0, %v47_v2 }
  0x56   :  { %1415 = vmatmul.mubr.msk.f32.gmra.mrb[38].mxu1 %vm252_vm0, %v47_v2  ;;  %533 = vmatprep.mubr.f32.mxu0 %v1594_v3 }
  0x57   :  { %790 = vmatprep.mubr.f32.mxu1 %v1594_v3 }
  0x59   :  { %1384 = vmatmul.mubr.msk.f32.gmra.mrb[40].mxu0 %vm252_vm0, %v48_v4 }
  0x5a   :  { %1416 = vmatmul.mubr.msk.f32.gmra.mrb[40].mxu1 %vm252_vm0, %v48_v4  ;;  %539 = vmatprep.mubr.f32.mxu0 %v1594_v3 }
  0x5b   :  { %796 = vmatprep.mubr.f32.mxu1 %v1594_v3 }
  0x5d   :  { %1385 = vmatmul.mubr.msk.f32.gmra.mrb[42].mxu0 %vm252_vm0, %v49_v5 }
  0x5e   :  { %1417 = vmatmul.mubr.msk.f32.gmra.mrb[42].mxu1 %vm252_vm0, %v49_v5  ;;  %545 = vmatprep.mubr.f32.mxu0 %v1594_v3 }
  0x5f   :  { %802 = vmatprep.mubr.f32.mxu1 %v1594_v3 }
  0x61   :  { %1386 = vmatmul.mubr.msk.f32.gmra.mrb[44].mxu0 %vm252_vm0, %v50_v6 }
  0x62   :  { %1418 = vmatmul.mubr.msk.f32.gmra.mrb[44].mxu1 %vm252_vm0, %v50_v6  ;;  %551 = vmatprep.mubr.f32.mxu0 %v1594_v3 }
  0x63   :  { %808 = vmatprep.mubr.f32.mxu1 %v1594_v3 }
  0x65   :  { %1387 = vmatmul.mubr.msk.f32.gmra.mrb[46].mxu0 %vm252_vm0, %v51_v7 }
  0x66   :  { %1419 = vmatmul.mubr.msk.f32.gmra.mrb[46].mxu1 %vm252_vm0, %v51_v7  ;;  %557 = vmatprep.mubr.f32.mxu0 %v1594_v3 }
  0x67   :  { %814 = vmatprep.mubr.f32.mxu1 %v1594_v3 }
  0x69   :  { %1388 = vmatmul.mubr.msk.f32.gmra.mrb[48].mxu0 %vm252_vm0, %v52_v8 }
  0x6a   :  { %1420 = vmatmul.mubr.msk.f32.gmra.mrb[48].mxu1 %vm252_vm0, %v52_v8  ;;  %563 = vmatprep.mubr.f32.mxu0 %v1594_v3 }
  0x6b   :  { %820 = vmatprep.mubr.f32.mxu1 %v1594_v3 }
  0x6d   :  { %1389 = vmatmul.mubr.msk.f32.gmra.mrb[50].mxu0 %vm252_vm0, %v53_v9 }
  0x6e   :  { %1421 = vmatmul.mubr.msk.f32.gmra.mrb[50].mxu1 %vm252_vm0, %v53_v9  ;;  %569 = vmatprep.mubr.f32.mxu0 %v1594_v3 }
  0x6f   :  { %826 = vmatprep.mubr.f32.mxu1 %v1594_v3 }
  0x71   :  { %1390 = vmatmul.mubr.msk.f32.gmra.mrb[52].mxu0 %vm252_vm0, %v54_v10 }
  0x72   :  { %1422 = vmatmul.mubr.msk.f32.gmra.mrb[52].mxu1 %vm252_vm0, %v54_v10  ;;  %575 = vmatprep.mubr.f32.mxu0 %v1594_v3 }
  0x73   :  { %832 = vmatprep.mubr.f32.mxu1 %v1594_v3 }
  0x75   :  { %1391 = vmatmul.mubr.msk.f32.gmra.mrb[54].mxu0 %vm252_vm0, %v55_v11 }
  0x76   :  { %1423 = vmatmul.mubr.msk.f32.gmra.mrb[54].mxu1 %vm252_vm0, %v55_v11  ;;  %581 = vmatprep.mubr.f32.mxu0 %v1594_v3 }
  0x77   :  { %838 = vmatprep.mubr.f32.mxu1 %v1594_v3 }
  0x79   :  { %1392 = vmatmul.mubr.msk.f32.gmra.mrb[56].mxu0 %vm252_vm0, %v56_v12 }
  0x7a   :  { %1424 = vmatmul.mubr.msk.f32.gmra.mrb[56].mxu1 %vm252_vm0, %v56_v12  ;;  %587 = vmatprep.mubr.f32.mxu0 %v1594_v3 }
  0x7b   :  { %844 = vmatprep.mubr.f32.mxu1 %v1594_v3 }
  0x7d   :  { %1393 = vmatmul.mubr.msk.f32.gmra.mrb[58].mxu0 %vm252_vm0, %v57_v13 }
  0x7e   :  { %1425 = vmatmul.mubr.msk.f32.gmra.mrb[58].mxu1 %vm252_vm0, %v57_v13  ;;  %593 = vmatprep.mubr.f32.mxu0 %v1594_v3 }
  0x7f   :  { %850 = vmatprep.mubr.f32.mxu1 %v1594_v3 }
  0x81   :  { %1394 = vmatmul.mubr.msk.f32.gmra.mrb[60].mxu0 %vm252_vm0, %v58_v14 }
  0x82   :  { %1426 = vmatmul.mubr.msk.f32.gmra.mrb[60].mxu1 %vm252_vm0, %v58_v14  ;;  %599 = vmatprep.mubr.f32.mxu0 %v1594_v3 }
  0x83   :  { %856 = vmatprep.mubr.f32.mxu1 %v1594_v3 }
  0x85   :  { %1395 = vmatmul.mubr.msk.f32.gmra.mrb[62].mxu0 %vm252_vm0, %v59_v15  ;;  %v95_v16 = vpop.permute.xlu0 %94 }
  0x86   :  { %1427 = vmatmul.mubr.msk.f32.gmra.mrb[62].mxu1 %vm252_vm0, %v59_v15  ;;  %v105_v32 = vpop.permute.xlu1 %104  ;;  %1193 = vmatprep.mubr.f32.mxu0 %v1127_v45 }
  0x87   :  { %1264 = vmatprep.mubr.f32.mxu1 %v1127_v45 }
  0x8a   :  { %v100_v26 = vpop.permute.xlu0 %99 }
  0x8b   :  { %v110_v61 = vpop.permute.xlu1 %109 }
  0x8e   :  { %v115_v15 = vpop.permute.xlu0 %114 }
  0xdc   :  { %v415_v17 = vpop.f32.mrb[0].mxu0 }
  0xdd   :  { %v416_v18 = vadd.f32 %v415_v17, %v95_v16  ;;  %v672_v19 = vpop.f32.mrb[0].mxu1  ;;  %v417_v20 = vpop.f32.mrb[1].mxu0 }
  0xde   :  { %v673_v21 = vadd.f32 %v672_v19, %v95_v16  ;;  %v418_v22 = vadd.f32 %v417_v20, %v95_v16  ;;  %v674_v23 = vpop.f32.mrb[1].mxu1 }
  0xdf   :  { %v863_v24 = vmax.f32 %v416_v18, 0.0  ;;  %v675_v25 = vadd.f32 %v674_v23, %v95_v16 }
  0xe0   :  { %v865_v27 = vmax.f32 %v673_v21, 0.0  ;;  %v421_v28 = vpop.f32.mrb[2].mxu0  ;;  %v864_v29 = vmax.f32 %v418_v22, 0.0 }
  0xe1   :  { %v422_v30 = vadd.f32 %v421_v28, %v100_v26  ;;  %v678_v3 = vpop.f32.mrb[2].mxu1  ;;  %v423_v31 = vpop.f32.mrb[3].mxu0  ;;  %v991_v36 = vmin.f32 %v863_v24, 6.0  ;;  %v866_v37 = vmax.f32 %v675_v25, 0.0 }
  0xe2   :  { %v679_v33 = vadd.f32 %v678_v3, %v100_v26  ;;  %v424_v34 = vadd.f32 %v423_v31, %v100_v26  ;;  %v680_v35 = vpop.f32.mrb[3].mxu1  ;;  %v993_v41 = vmin.f32 %v865_v27, 6.0  ;;  %v992_v46 = vmin.f32 %v864_v29, 6.0 }
  0xe3   :  { %v867_v38 = vmax.f32 %v422_v30, 0.0  ;;  %v681_v39 = vadd.f32 %v680_v35, %v100_v26  ;;  %v994_v57 = vmin.f32 %v866_v37, 6.0  ;;  %v120_v35 = vpop.permute.xlu1 %119 }
  0xe4   :  { %v869_v42 = vmax.f32 %v679_v33, 0.0  ;;  %v868_v43 = vmax.f32 %v424_v34, 0.0  ;;  %v427_v44 = vpop.f32.mrb[4].mxu0 }
  0xe5   :  { %v995_v47 = vmin.f32 %v867_v38, 6.0  ;;  %v870_v48 = vmax.f32 %v681_v39, 0.0  ;;  %v428_v49 = vadd.f32 %v427_v44, %v105_v32  ;;  %v684_v50 = vpop.f32.mrb[4].mxu1  ;;  %v429_v51 = vpop.f32.mrb[5].mxu0 }
  0xe6   :  { %v997_v52 = vmin.f32 %v869_v42, 6.0  ;;  %v996_v53 = vmin.f32 %v868_v43, 6.0  ;;  %v685_v54 = vadd.f32 %v684_v50, %v105_v32  ;;  %v430_v55 = vadd.f32 %v429_v51, %v105_v32  ;;  %v686_v56 = vpop.f32.mrb[5].mxu1 }
  0xe7   :  { %v1438_v58 = vpack.c.bf16 %v995_v47, %v991_v36  ;;  %v998_v59 = vmin.f32 %v870_v48, 6.0  ;;  %v687_v60 = vadd.f32 %v686_v56, %v105_v32  ;;  %v871_v0 = vmax.f32 %v428_v49, 0.0 }
  0xe8   :  { %v1502_v62 = vpack.c.bf16 %v997_v52, %v993_v41  ;;  %v1436_v63 = vpack.c.bf16 %v996_v53, %v992_v46  ;;  %v873_v1 = vmax.f32 %v685_v54, 0.0  ;;  %v433_v2 = vpop.f32.mrb[6].mxu0  ;;  %v872_v5 = vmax.f32 %v430_v55, 0.0  ;;  %v125_v52 = vpop.permute.xlu0 %124 }
  0xe9   :  { %v1500_v4 = vpack.c.bf16 %v998_v59, %v994_v57  ;;  %v434_v6 = vadd.f32 %v433_v2, %v110_v61  ;;  %v690_v7 = vpop.f32.mrb[6].mxu1  ;;  %v435_v8 = vpop.f32.mrb[7].mxu0  ;;  %v874_v12 = vmax.f32 %v687_v60, 0.0  ;;  %v999_v16 = vmin.f32 %v871_v0, 6.0 }
  0xea   :  { %v691_v9 = vadd.f32 %v690_v7, %v110_v61  ;;  %v436_v10 = vadd.f32 %v435_v8, %v110_v61  ;;  %v692_v11 = vpop.f32.mrb[7].mxu1  ;;  %1437 = vmatprep.subr.bf16.mxu0 %v1436_v63  ;;  %v1001_v17 = vmin.f32 %v873_v1, 6.0  ;;  %v1000_v21 = vmin.f32 %v872_v5, 6.0 }
  0xeb   :  { %v875_v13 = vmax.f32 %v434_v6, 0.0  ;;  %v693_v14 = vadd.f32 %v692_v11, %v110_v61  ;;  %1501 = vmatprep.subr.bf16.mxu1 %v1500_v4  ;;  %1439 = vmatpush1.bf16.msra.mxu0 %v1438_v58  ;;  %v1002_v31 = vmin.f32 %v874_v12, 6.0 }
  0xec   :  { %v877_v18 = vmax.f32 %v691_v9, 0.0  ;;  %v876_v19 = vmax.f32 %v436_v10, 0.0  ;;  %1503 = vmatpush1.bf16.msra.mxu1 %v1502_v62  ;;  %v439_v20 = vpop.f32.mrb[8].mxu0  ;;  %v130_v10 = vpop.permute.xlu1 %129 }
  0xed   :  { %v1003_v22 = vmin.f32 %v875_v13, 6.0  ;;  %v878_v23 = vmax.f32 %v693_v14, 0.0  ;;  %v440_v24 = vadd.f32 %v439_v20, %v115_v15  ;;  %v696_v25 = vpop.f32.mrb[8].mxu1  ;;  %v441_v26 = vpop.f32.mrb[9].mxu0 }
  0xee   :  { %v1005_v27 = vmin.f32 %v877_v18, 6.0  ;;  %v1004_v28 = vmin.f32 %v876_v19, 6.0  ;;  %v697_v29 = vadd.f32 %v696_v25, %v115_v15  ;;  %v442_v30 = vadd.f32 %v441_v26, %v115_v15  ;;  %v698_v3 = vpop.f32.mrb[9].mxu1 }
  0xef   :  { %v1442_v32 = vpack.c.bf16 %v1003_v22, %v999_v16  ;;  %v1006_v33 = vmin.f32 %v878_v23, 6.0  ;;  %v699_v34 = vadd.f32 %v698_v3, %v115_v15  ;;  %v879_v38 = vmax.f32 %v440_v24, 0.0 }
  0xf0   :  { %v1506_v36 = vpack.c.bf16 %v1005_v27, %v1001_v17  ;;  %v1440_v37 = vpack.c.bf16 %v1004_v28, %v1000_v21  ;;  %v881_v39 = vmax.f32 %v697_v29, 0.0  ;;  %v445_v40 = vpop.f32.mrb[10].mxu0  ;;  %v880_v42 = vmax.f32 %v442_v30, 0.0  ;;  %v135_v27 = vpop.permute.xlu0 %134 }
  0xf1   :  { %v1504_v41 = vpack.c.bf16 %v1006_v33, %v1002_v31  ;;  %v446_v43 = vadd.f32 %v445_v40, %v120_v35  ;;  %v702_v44 = vpop.f32.mrb[10].mxu1  ;;  %v447_v45 = vpop.f32.mrb[11].mxu0  ;;  %v882_v49 = vmax.f32 %v699_v34, 0.0  ;;  %v1007_v53 = vmin.f32 %v879_v38, 6.0 }
  0xf2   :  { %v703_v46 = vadd.f32 %v702_v44, %v120_v35  ;;  %v448_v47 = vadd.f32 %v447_v45, %v120_v35  ;;  %v704_v48 = vpop.f32.mrb[11].mxu1  ;;  %1441 = vmatprep.subr.bf16.mxu0 %v1440_v37  ;;  %v1009_v54 = vmin.f32 %v881_v39, 6.0  ;;  %v1008_v58 = vmin.f32 %v880_v42, 6.0 }
  0xf3   :  { %v883_v50 = vmax.f32 %v446_v43, 0.0  ;;  %v705_v51 = vadd.f32 %v704_v48, %v120_v35  ;;  %1505 = vmatprep.subr.bf16.mxu1 %v1504_v41  ;;  %1443 = vmatpush1.bf16.msra.mxu0 %v1442_v32  ;;  %v1010_v6 = vmin.f32 %v882_v49, 6.0 }
  0xf4   :  { %v885_v55 = vmax.f32 %v703_v46, 0.0  ;;  %v884_v56 = vmax.f32 %v448_v47, 0.0  ;;  %1507 = vmatpush1.bf16.msra.mxu1 %v1506_v36  ;;  %v451_v57 = vpop.f32.mrb[12].mxu0  ;;  %v140_v47 = vpop.permute.xlu1 %139 }
  0xf5   :  { %v1011_v59 = vmin.f32 %v883_v50, 6.0  ;;  %v886_v60 = vmax.f32 %v705_v51, 0.0  ;;  %v452_v61 = vadd.f32 %v451_v57, %v125_v52  ;;  %v708_v62 = vpop.f32.mrb[12].mxu1  ;;  %v453_v63 = vpop.f32.mrb[13].mxu0 }
  0xf6   :  { %v1013_v0 = vmin.f32 %v885_v55, 6.0  ;;  %v1012_v1 = vmin.f32 %v884_v56, 6.0  ;;  %v709_v2 = vadd.f32 %v708_v62, %v125_v52  ;;  %v454_v4 = vadd.f32 %v453_v63, %v125_v52  ;;  %v710_v5 = vpop.f32.mrb[13].mxu1 }
  0xf7   :  { %v1446_v7 = vpack.c.bf16 %v1011_v59, %v1007_v53  ;;  %v1014_v8 = vmin.f32 %v886_v60, 6.0  ;;  %v711_v9 = vadd.f32 %v710_v5, %v125_v52  ;;  %v887_v13 = vmax.f32 %v452_v61, 0.0 }
  0xf8   :  { %v1510_v11 = vpack.c.bf16 %v1013_v0, %v1009_v54  ;;  %v1444_v12 = vpack.c.bf16 %v1012_v1, %v1008_v58  ;;  %v889_v14 = vmax.f32 %v709_v2, 0.0  ;;  %v457_v15 = vpop.f32.mrb[14].mxu0  ;;  %v888_v17 = vmax.f32 %v454_v4, 0.0  ;;  %v145_v0 = vpop.permute.xlu0 %144 }
  0xf9   :  { %v1508_v16 = vpack.c.bf16 %v1014_v8, %v1010_v6  ;;  %v458_v18 = vadd.f32 %v457_v15, %v130_v10  ;;  %v714_v19 = vpop.f32.mrb[14].mxu1  ;;  %v459_v20 = vpop.f32.mrb[15].mxu0  ;;  %v890_v24 = vmax.f32 %v711_v9, 0.0  ;;  %v1015_v28 = vmin.f32 %v887_v13, 6.0 }
  0xfa   :  { %v715_v21 = vadd.f32 %v714_v19, %v130_v10  ;;  %v460_v22 = vadd.f32 %v459_v20, %v130_v10  ;;  %v716_v23 = vpop.f32.mrb[15].mxu1  ;;  %1445 = vmatprep.subr.bf16.mxu0 %v1444_v12  ;;  %v1017_v29 = vmin.f32 %v889_v14, 6.0  ;;  %v1016_v32 = vmin.f32 %v888_v17, 6.0 }
  0xfb   :  { %v891_v25 = vmax.f32 %v458_v18, 0.0  ;;  %v717_v26 = vadd.f32 %v716_v23, %v130_v10  ;;  %1509 = vmatprep.subr.bf16.mxu1 %v1508_v16  ;;  %1447 = vmatpush1.bf16.msra.mxu0 %v1446_v7  ;;  %v1018_v43 = vmin.f32 %v890_v24, 6.0 }
  0xfc   :  { %v893_v30 = vmax.f32 %v715_v21, 0.0  ;;  %v892_v3 = vmax.f32 %v460_v22, 0.0  ;;  %1511 = vmatpush1.bf16.msra.mxu1 %v1510_v11  ;;  %v463_v31 = vpop.f32.mrb[16].mxu0  ;;  %v150_v22 = vpop.permute.xlu1 %149 }
  0xfd   :  { %v1019_v33 = vmin.f32 %v891_v25, 6.0  ;;  %v894_v34 = vmax.f32 %v717_v26, 0.0  ;;  %v464_v35 = vadd.f32 %v463_v31, %v135_v27  ;;  %v720_v36 = vpop.f32.mrb[16].mxu1  ;;  %v465_v37 = vpop.f32.mrb[17].mxu0 }
  0xfe   :  { %v1021_v38 = vmin.f32 %v893_v30, 6.0  ;;  %v1020_v39 = vmin.f32 %v892_v3, 6.0  ;;  %v721_v40 = vadd.f32 %v720_v36, %v135_v27  ;;  %v466_v41 = vadd.f32 %v465_v37, %v135_v27  ;;  %v722_v42 = vpop.f32.mrb[17].mxu1 }
  0xff   :  { %v1450_v44 = vpack.c.bf16 %v1019_v33, %v1015_v28  ;;  %v1022_v45 = vmin.f32 %v894_v34, 6.0  ;;  %v723_v46 = vadd.f32 %v722_v42, %v135_v27  ;;  %v895_v50 = vmax.f32 %v464_v35, 0.0 }
 0x100   :  { %v1514_v48 = vpack.c.bf16 %v1021_v38, %v1017_v29  ;;  %v1448_v49 = vpack.c.bf16 %v1020_v39, %v1016_v32  ;;  %v897_v51 = vmax.f32 %v721_v40, 0.0  ;;  %v469_v52 = vpop.f32.mrb[18].mxu0  ;;  %v896_v54 = vmax.f32 %v466_v41, 0.0  ;;  %v155_v38 = vpop.permute.xlu0 %154 }
 0x101   :  { %v1512_v53 = vpack.c.bf16 %v1022_v45, %v1018_v43  ;;  %v470_v55 = vadd.f32 %v469_v52, %v140_v47  ;;  %v726_v56 = vpop.f32.mrb[18].mxu1  ;;  %v471_v57 = vpop.f32.mrb[19].mxu0  ;;  %v898_v61 = vmax.f32 %v723_v46, 0.0  ;;  %v1023_v1 = vmin.f32 %v895_v50, 6.0 }
 0x102   :  { %v727_v58 = vadd.f32 %v726_v56, %v140_v47  ;;  %v472_v59 = vadd.f32 %v471_v57, %v140_v47  ;;  %v728_v60 = vpop.f32.mrb[19].mxu1  ;;  %1449 = vmatprep.subr.bf16.mxu0 %v1448_v49  ;;  %v1025_v2 = vmin.f32 %v897_v51, 6.0  ;;  %v1024_v7 = vmin.f32 %v896_v54, 6.0 }
 0x103   :  { %v899_v62 = vmax.f32 %v470_v55, 0.0  ;;  %v729_v63 = vadd.f32 %v728_v60, %v140_v47  ;;  %1513 = vmatprep.subr.bf16.mxu1 %v1512_v53  ;;  %1451 = vmatpush1.bf16.msra.mxu0 %v1450_v44  ;;  %v1026_v18 = vmin.f32 %v898_v61, 6.0 }
 0x104   :  { %v901_v4 = vmax.f32 %v727_v58, 0.0  ;;  %v900_v5 = vmax.f32 %v472_v59, 0.0  ;;  %1515 = vmatpush1.bf16.msra.mxu1 %v1514_v48  ;;  %v475_v6 = vpop.f32.mrb[20].mxu0  ;;  %v160_v59 = vpop.permute.xlu1 %159 }
 0x105   :  { %v1027_v8 = vmin.f32 %v899_v62, 6.0  ;;  %v902_v9 = vmax.f32 %v729_v63, 0.0  ;;  %v476_v10 = vadd.f32 %v475_v6, %v145_v0  ;;  %v732_v11 = vpop.f32.mrb[20].mxu1  ;;  %v477_v12 = vpop.f32.mrb[21].mxu0 }
 0x106   :  { %v1029_v13 = vmin.f32 %v901_v4, 6.0  ;;  %v1028_v14 = vmin.f32 %v900_v5, 6.0  ;;  %v733_v15 = vadd.f32 %v732_v11, %v145_v0  ;;  %v478_v16 = vadd.f32 %v477_v12, %v145_v0  ;;  %v734_v17 = vpop.f32.mrb[21].mxu1 }
 0x107   :  { %v1454_v19 = vpack.c.bf16 %v1027_v8, %v1023_v1  ;;  %v1030_v20 = vmin.f32 %v902_v9, 6.0  ;;  %v735_v21 = vadd.f32 %v734_v17, %v145_v0  ;;  %v903_v25 = vmax.f32 %v476_v10, 0.0 }
 0x108   :  { %v1518_v23 = vpack.c.bf16 %v1029_v13, %v1025_v2  ;;  %v1452_v24 = vpack.c.bf16 %v1028_v14, %v1024_v7  ;;  %v905_v26 = vmax.f32 %v733_v15, 0.0  ;;  %v481_v27 = vpop.f32.mrb[22].mxu0  ;;  %v904_v29 = vmax.f32 %v478_v16, 0.0  ;;  %v165_v13 = vpop.permute.xlu0 %164 }
 0x109   :  { %v1516_v28 = vpack.c.bf16 %v1030_v20, %v1026_v18  ;;  %v482_v30 = vadd.f32 %v481_v27, %v150_v22  ;;  %v738_v3 = vpop.f32.mrb[22].mxu1  ;;  %v483_v31 = vpop.f32.mrb[23].mxu0  ;;  %v906_v35 = vmax.f32 %v735_v21, 0.0  ;;  %v1031_v39 = vmin.f32 %v903_v25, 6.0 }
 0x10a   :  { %v739_v32 = vadd.f32 %v738_v3, %v150_v22  ;;  %v484_v33 = vadd.f32 %v483_v31, %v150_v22  ;;  %v740_v34 = vpop.f32.mrb[23].mxu1  ;;  %1453 = vmatprep.subr.bf16.mxu0 %v1452_v24  ;;  %v1033_v40 = vmin.f32 %v905_v26, 6.0  ;;  %v1032_v44 = vmin.f32 %v904_v29, 6.0 }
 0x10b   :  { %v907_v36 = vmax.f32 %v482_v30, 0.0  ;;  %v741_v37 = vadd.f32 %v740_v34, %v150_v22  ;;  %1517 = vmatprep.subr.bf16.mxu1 %v1516_v28  ;;  %1455 = vmatpush1.bf16.msra.mxu0 %v1454_v19  ;;  %v1034_v55 = vmin.f32 %v906_v35, 6.0 }
 0x10c   :  { %v909_v41 = vmax.f32 %v739_v32, 0.0  ;;  %v908_v42 = vmax.f32 %v484_v33, 0.0  ;;  %1519 = vmatpush1.bf16.msra.mxu1 %v1518_v23  ;;  %v487_v43 = vpop.f32.mrb[24].mxu0  ;;  %v170_v33 = vpop.permute.xlu1 %169 }
 0x10d   :  { %v1035_v45 = vmin.f32 %v907_v36, 6.0  ;;  %v910_v46 = vmax.f32 %v741_v37, 0.0  ;;  %v488_v47 = vadd.f32 %v487_v43, %v155_v38  ;;  %v744_v48 = vpop.f32.mrb[24].mxu1  ;;  %v489_v49 = vpop.f32.mrb[25].mxu0 }
 0x10e   :  { %v1037_v50 = vmin.f32 %v909_v41, 6.0  ;;  %v1036_v51 = vmin.f32 %v908_v42, 6.0  ;;  %v745_v52 = vadd.f32 %v744_v48, %v155_v38  ;;  %v490_v53 = vadd.f32 %v489_v49, %v155_v38  ;;  %v746_v54 = vpop.f32.mrb[25].mxu1 }
 0x10f   :  { %v1458_v56 = vpack.c.bf16 %v1035_v45, %v1031_v39  ;;  %v1038_v57 = vmin.f32 %v910_v46, 6.0  ;;  %v747_v58 = vadd.f32 %v746_v54, %v155_v38  ;;  %v911_v62 = vmax.f32 %v488_v47, 0.0 }
 0x110   :  { %v1522_v60 = vpack.c.bf16 %v1037_v50, %v1033_v40  ;;  %v1456_v61 = vpack.c.bf16 %v1036_v51, %v1032_v44  ;;  %v913_v63 = vmax.f32 %v745_v52, 0.0  ;;  %v493_v0 = vpop.f32.mrb[26].mxu0  ;;  %v912_v2 = vmax.f32 %v490_v53, 0.0  ;;  %v175_v50 = vpop.permute.xlu0 %174 }
 0x111   :  { %v1520_v1 = vpack.c.bf16 %v1038_v57, %v1034_v55  ;;  %v494_v4 = vadd.f32 %v493_v0, %v160_v59  ;;  %v750_v5 = vpop.f32.mrb[26].mxu1  ;;  %v495_v6 = vpop.f32.mrb[27].mxu0  ;;  %v914_v10 = vmax.f32 %v747_v58, 0.0  ;;  %v1039_v14 = vmin.f32 %v911_v62, 6.0 }
 0x112   :  { %v751_v7 = vadd.f32 %v750_v5, %v160_v59  ;;  %v496_v8 = vadd.f32 %v495_v6, %v160_v59  ;;  %v752_v9 = vpop.f32.mrb[27].mxu1  ;;  %1457 = vmatprep.subr.bf16.mxu0 %v1456_v61  ;;  %v1041_v15 = vmin.f32 %v913_v63, 6.0  ;;  %v1040_v19 = vmin.f32 %v912_v2, 6.0 }
 0x113   :  { %v915_v11 = vmax.f32 %v494_v4, 0.0  ;;  %v753_v12 = vadd.f32 %v752_v9, %v160_v59  ;;  %1521 = vmatprep.subr.bf16.mxu1 %v1520_v1  ;;  %1459 = vmatpush1.bf16.msra.mxu0 %v1458_v56  ;;  %v1042_v30 = vmin.f32 %v914_v10, 6.0 }
 0x114   :  { %v917_v16 = vmax.f32 %v751_v7, 0.0  ;;  %v916_v17 = vmax.f32 %v496_v8, 0.0  ;;  %1523 = vmatpush1.bf16.msra.mxu1 %v1522_v60  ;;  %v499_v18 = vpop.f32.mrb[28].mxu0  ;;  %v180_v8 = vpop.permute.xlu1 %179 }
 0x115   :  { %v1043_v20 = vmin.f32 %v915_v11, 6.0  ;;  %v918_v21 = vmax.f32 %v753_v12, 0.0  ;;  %v500_v22 = vadd.f32 %v499_v18, %v165_v13  ;;  %v756_v23 = vpop.f32.mrb[28].mxu1  ;;  %v501_v24 = vpop.f32.mrb[29].mxu0 }
 0x116   :  { %v1045_v25 = vmin.f32 %v917_v16, 6.0  ;;  %v1044_v26 = vmin.f32 %v916_v17, 6.0  ;;  %v757_v27 = vadd.f32 %v756_v23, %v165_v13  ;;  %v502_v28 = vadd.f32 %v501_v24, %v165_v13  ;;  %v758_v29 = vpop.f32.mrb[29].mxu1 }
 0x117   :  { %v1462_v3 = vpack.c.bf16 %v1043_v20, %v1039_v14  ;;  %v1046_v31 = vmin.f32 %v918_v21, 6.0  ;;  %v759_v32 = vadd.f32 %v758_v29, %v165_v13  ;;  %v919_v36 = vmax.f32 %v500_v22, 0.0 }
 0x118   :  { %v1526_v34 = vpack.c.bf16 %v1045_v25, %v1041_v15  ;;  %v1460_v35 = vpack.c.bf16 %v1044_v26, %v1040_v19  ;;  %v921_v37 = vmax.f32 %v757_v27, 0.0  ;;  %v505_v38 = vpop.f32.mrb[30].mxu0  ;;  %v920_v40 = vmax.f32 %v502_v28, 0.0  ;;  %v185_v25 = vpop.permute.xlu0 %184 }
 0x119   :  { %v1524_v39 = vpack.c.bf16 %v1046_v31, %v1042_v30  ;;  %v506_v41 = vadd.f32 %v505_v38, %v170_v33  ;;  %v762_v42 = vpop.f32.mrb[30].mxu1  ;;  %v507_v43 = vpop.f32.mrb[31].mxu0  ;;  %v922_v47 = vmax.f32 %v759_v32, 0.0  ;;  %v1047_v51 = vmin.f32 %v919_v36, 6.0 }
 0x11a   :  { %v763_v44 = vadd.f32 %v762_v42, %v170_v33  ;;  %v508_v45 = vadd.f32 %v507_v43, %v170_v33  ;;  %v764_v46 = vpop.f32.mrb[31].mxu1  ;;  %1461 = vmatprep.subr.bf16.mxu0 %v1460_v35  ;;  %v1049_v52 = vmin.f32 %v921_v37, 6.0  ;;  %v1048_v56 = vmin.f32 %v920_v40, 6.0 }
 0x11b   :  { %v923_v48 = vmax.f32 %v506_v41, 0.0  ;;  %v765_v49 = vadd.f32 %v764_v46, %v170_v33  ;;  %1525 = vmatprep.subr.bf16.mxu1 %v1524_v39  ;;  %1463 = vmatpush1.bf16.msra.mxu0 %v1462_v3  ;;  %v1050_v4 = vmin.f32 %v922_v47, 6.0 }
 0x11c   :  { %v925_v53 = vmax.f32 %v763_v44, 0.0  ;;  %v924_v54 = vmax.f32 %v508_v45, 0.0  ;;  %1527 = vmatpush1.bf16.msra.mxu1 %v1526_v34  ;;  %v511_v55 = vpop.f32.mrb[32].mxu0  ;;  %v190_v45 = vpop.permute.xlu1 %189 }
 0x11d   :  { %v1051_v57 = vmin.f32 %v923_v48, 6.0  ;;  %v926_v58 = vmax.f32 %v765_v49, 0.0  ;;  %v512_v59 = vadd.f32 %v511_v55, %v175_v50  ;;  %v768_v60 = vpop.f32.mrb[32].mxu1  ;;  %v513_v61 = vpop.f32.mrb[33].mxu0 }
 0x11e   :  { %v1053_v62 = vmin.f32 %v925_v53, 6.0  ;;  %v1052_v63 = vmin.f32 %v924_v54, 6.0  ;;  %v769_v0 = vadd.f32 %v768_v60, %v175_v50  ;;  %v514_v1 = vadd.f32 %v513_v61, %v175_v50  ;;  %v770_v2 = vpop.f32.mrb[33].mxu1 }
 0x11f   :  { %v1466_v5 = vpack.c.bf16 %v1051_v57, %v1047_v51  ;;  %v1054_v6 = vmin.f32 %v926_v58, 6.0  ;;  %v771_v7 = vadd.f32 %v770_v2, %v175_v50  ;;  %v927_v11 = vmax.f32 %v512_v59, 0.0 }
 0x120   :  { %v1530_v9 = vpack.c.bf16 %v1053_v62, %v1049_v52  ;;  %v1464_v10 = vpack.c.bf16 %v1052_v63, %v1048_v56  ;;  %v929_v12 = vmax.f32 %v769_v0, 0.0  ;;  %v517_v13 = vpop.f32.mrb[34].mxu0  ;;  %v928_v15 = vmax.f32 %v514_v1, 0.0  ;;  %v195_v62 = vpop.permute.xlu0 %194 }
 0x121   :  { %v1528_v14 = vpack.c.bf16 %v1054_v6, %v1050_v4  ;;  %v518_v16 = vadd.f32 %v517_v13, %v180_v8  ;;  %v774_v17 = vpop.f32.mrb[34].mxu1  ;;  %v519_v18 = vpop.f32.mrb[35].mxu0  ;;  %v930_v22 = vmax.f32 %v771_v7, 0.0  ;;  %v1055_v26 = vmin.f32 %v927_v11, 6.0 }
 0x122   :  { %v775_v19 = vadd.f32 %v774_v17, %v180_v8  ;;  %v520_v20 = vadd.f32 %v519_v18, %v180_v8  ;;  %v776_v21 = vpop.f32.mrb[35].mxu1  ;;  %1465 = vmatprep.subr.bf16.mxu0 %v1464_v10  ;;  %v1057_v27 = vmin.f32 %v929_v12, 6.0  ;;  %v1056_v3 = vmin.f32 %v928_v15, 6.0 }
 0x123   :  { %v931_v23 = vmax.f32 %v518_v16, 0.0  ;;  %v777_v24 = vadd.f32 %v776_v21, %v180_v8  ;;  %1529 = vmatprep.subr.bf16.mxu1 %v1528_v14  ;;  %1467 = vmatpush1.bf16.msra.mxu0 %v1466_v5  ;;  %v1058_v41 = vmin.f32 %v930_v22, 6.0 }
 0x124   :  { %v933_v28 = vmax.f32 %v775_v19, 0.0  ;;  %v932_v29 = vmax.f32 %v520_v20, 0.0  ;;  %1531 = vmatpush1.bf16.msra.mxu1 %v1530_v9  ;;  %v523_v30 = vpop.f32.mrb[36].mxu0  ;;  %v200_v20 = vpop.permute.xlu1 %199 }
 0x125   :  { %v1059_v31 = vmin.f32 %v931_v23, 6.0  ;;  %v934_v32 = vmax.f32 %v777_v24, 0.0  ;;  %v524_v33 = vadd.f32 %v523_v30, %v185_v25  ;;  %v780_v34 = vpop.f32.mrb[36].mxu1  ;;  %v525_v35 = vpop.f32.mrb[37].mxu0 }
 0x126   :  { %v1061_v36 = vmin.f32 %v933_v28, 6.0  ;;  %v1060_v37 = vmin.f32 %v932_v29, 6.0  ;;  %v781_v38 = vadd.f32 %v780_v34, %v185_v25  ;;  %v526_v39 = vadd.f32 %v525_v35, %v185_v25  ;;  %v782_v40 = vpop.f32.mrb[37].mxu1 }
 0x127   :  { %v1470_v42 = vpack.c.bf16 %v1059_v31, %v1055_v26  ;;  %v1062_v43 = vmin.f32 %v934_v32, 6.0  ;;  %v783_v44 = vadd.f32 %v782_v40, %v185_v25  ;;  %v935_v48 = vmax.f32 %v524_v33, 0.0 }
 0x128   :  { %v1534_v46 = vpack.c.bf16 %v1061_v36, %v1057_v27  ;;  %v1468_v47 = vpack.c.bf16 %v1060_v37, %v1056_v3  ;;  %v937_v49 = vmax.f32 %v781_v38, 0.0  ;;  %v529_v50 = vpop.f32.mrb[38].mxu0  ;;  %v936_v52 = vmax.f32 %v526_v39, 0.0  ;;  %v205_v36 = vpop.permute.xlu0 %204 }
 0x129   :  { %v1532_v51 = vpack.c.bf16 %v1062_v43, %v1058_v41  ;;  %v530_v53 = vadd.f32 %v529_v50, %v190_v45  ;;  %v786_v54 = vpop.f32.mrb[38].mxu1  ;;  %v531_v55 = vpop.f32.mrb[39].mxu0  ;;  %v938_v59 = vmax.f32 %v783_v44, 0.0  ;;  %v1063_v63 = vmin.f32 %v935_v48, 6.0 }
 0x12a   :  { %v787_v56 = vadd.f32 %v786_v54, %v190_v45  ;;  %v532_v57 = vadd.f32 %v531_v55, %v190_v45  ;;  %v788_v58 = vpop.f32.mrb[39].mxu1  ;;  %1469 = vmatprep.subr.bf16.mxu0 %v1468_v47  ;;  %v1065_v0 = vmin.f32 %v937_v49, 6.0  ;;  %v1064_v5 = vmin.f32 %v936_v52, 6.0 }
 0x12b   :  { %v939_v60 = vmax.f32 %v530_v53, 0.0  ;;  %v789_v61 = vadd.f32 %v788_v58, %v190_v45  ;;  %1533 = vmatprep.subr.bf16.mxu1 %v1532_v51  ;;  %1471 = vmatpush1.bf16.msra.mxu0 %v1470_v42  ;;  %v1066_v16 = vmin.f32 %v938_v59, 6.0 }
 0x12c   :  { %v941_v1 = vmax.f32 %v787_v56, 0.0  ;;  %v940_v2 = vmax.f32 %v532_v57, 0.0  ;;  %1535 = vmatpush1.bf16.msra.mxu1 %v1534_v46  ;;  %v535_v4 = vpop.f32.mrb[40].mxu0  ;;  %v210_v57 = vpop.permute.xlu1 %209 }
 0x12d   :  { %v1067_v6 = vmin.f32 %v939_v60, 6.0  ;;  %v942_v7 = vmax.f32 %v789_v61, 0.0  ;;  %v536_v8 = vadd.f32 %v535_v4, %v195_v62  ;;  %v792_v9 = vpop.f32.mrb[40].mxu1  ;;  %v537_v10 = vpop.f32.mrb[41].mxu0 }
 0x12e   :  { %v1069_v11 = vmin.f32 %v941_v1, 6.0  ;;  %v1068_v12 = vmin.f32 %v940_v2, 6.0  ;;  %v793_v13 = vadd.f32 %v792_v9, %v195_v62  ;;  %v538_v14 = vadd.f32 %v537_v10, %v195_v62  ;;  %v794_v15 = vpop.f32.mrb[41].mxu1 }
 0x12f   :  { %v1474_v17 = vpack.c.bf16 %v1067_v6, %v1063_v63  ;;  %v1070_v18 = vmin.f32 %v942_v7, 6.0  ;;  %v795_v19 = vadd.f32 %v794_v15, %v195_v62  ;;  %v943_v23 = vmax.f32 %v536_v8, 0.0 }
 0x130   :  { %v1538_v21 = vpack.c.bf16 %v1069_v11, %v1065_v0  ;;  %v1472_v22 = vpack.c.bf16 %v1068_v12, %v1064_v5  ;;  %v945_v24 = vmax.f32 %v793_v13, 0.0  ;;  %v541_v25 = vpop.f32.mrb[42].mxu0  ;;  %v944_v27 = vmax.f32 %v538_v14, 0.0  ;;  %v215_v11 = vpop.permute.xlu0 %214 }
 0x131   :  { %v1536_v26 = vpack.c.bf16 %v1070_v18, %v1066_v16  ;;  %v542_v28 = vadd.f32 %v541_v25, %v200_v20  ;;  %v798_v29 = vpop.f32.mrb[42].mxu1  ;;  %v543_v30 = vpop.f32.mrb[43].mxu0  ;;  %v946_v33 = vmax.f32 %v795_v19, 0.0  ;;  %v1071_v37 = vmin.f32 %v943_v23, 6.0 }
 0x132   :  { %v799_v3 = vadd.f32 %v798_v29, %v200_v20  ;;  %v544_v31 = vadd.f32 %v543_v30, %v200_v20  ;;  %v800_v32 = vpop.f32.mrb[43].mxu1  ;;  %1473 = vmatprep.subr.bf16.mxu0 %v1472_v22  ;;  %v1073_v38 = vmin.f32 %v945_v24, 6.0  ;;  %v1072_v42 = vmin.f32 %v944_v27, 6.0 }
 0x133   :  { %v947_v34 = vmax.f32 %v542_v28, 0.0  ;;  %v801_v35 = vadd.f32 %v800_v32, %v200_v20  ;;  %1537 = vmatprep.subr.bf16.mxu1 %v1536_v26  ;;  %1475 = vmatpush1.bf16.msra.mxu0 %v1474_v17  ;;  %v1074_v53 = vmin.f32 %v946_v33, 6.0 }
 0x134   :  { %v949_v39 = vmax.f32 %v799_v3, 0.0  ;;  %v948_v40 = vmax.f32 %v544_v31, 0.0  ;;  %1539 = vmatpush1.bf16.msra.mxu1 %v1538_v21  ;;  %v547_v41 = vpop.f32.mrb[44].mxu0  ;;  %v220_v31 = vpop.permute.xlu1 %219 }
 0x135   :  { %v1075_v43 = vmin.f32 %v947_v34, 6.0  ;;  %v950_v44 = vmax.f32 %v801_v35, 0.0  ;;  %v548_v45 = vadd.f32 %v547_v41, %v205_v36  ;;  %v804_v46 = vpop.f32.mrb[44].mxu1  ;;  %v549_v47 = vpop.f32.mrb[45].mxu0 }
 0x136   :  { %v1077_v48 = vmin.f32 %v949_v39, 6.0  ;;  %v1076_v49 = vmin.f32 %v948_v40, 6.0  ;;  %v805_v50 = vadd.f32 %v804_v46, %v205_v36  ;;  %v550_v51 = vadd.f32 %v549_v47, %v205_v36  ;;  %v806_v52 = vpop.f32.mrb[45].mxu1 }
 0x137   :  { %v1478_v54 = vpack.c.bf16 %v1075_v43, %v1071_v37  ;;  %v1078_v55 = vmin.f32 %v950_v44, 6.0  ;;  %v807_v56 = vadd.f32 %v806_v52, %v205_v36  ;;  %v951_v60 = vmax.f32 %v548_v45, 0.0 }
 0x138   :  { %v1542_v58 = vpack.c.bf16 %v1077_v48, %v1073_v38  ;;  %v1476_v59 = vpack.c.bf16 %v1076_v49, %v1072_v42  ;;  %v953_v61 = vmax.f32 %v805_v50, 0.0  ;;  %v553_v62 = vpop.f32.mrb[46].mxu0  ;;  %v952_v0 = vmax.f32 %v550_v51, 0.0  ;;  %v225_v48 = vpop.permute.xlu0 %224 }
 0x139   :  { %v1540_v63 = vpack.c.bf16 %v1078_v55, %v1074_v53  ;;  %v554_v1 = vadd.f32 %v553_v62, %v210_v57  ;;  %v810_v2 = vpop.f32.mrb[46].mxu1  ;;  %v555_v4 = vpop.f32.mrb[47].mxu0  ;;  %v954_v8 = vmax.f32 %v807_v56, 0.0  ;;  %v1079_v12 = vmin.f32 %v951_v60, 6.0 }
 0x13a   :  { %v811_v5 = vadd.f32 %v810_v2, %v210_v57  ;;  %v556_v6 = vadd.f32 %v555_v4, %v210_v57  ;;  %v812_v7 = vpop.f32.mrb[47].mxu1  ;;  %1477 = vmatprep.subr.bf16.mxu0 %v1476_v59  ;;  %v1081_v13 = vmin.f32 %v953_v61, 6.0  ;;  %v1080_v17 = vmin.f32 %v952_v0, 6.0 }
 0x13b   :  { %v955_v9 = vmax.f32 %v554_v1, 0.0  ;;  %v813_v10 = vadd.f32 %v812_v7, %v210_v57  ;;  %1541 = vmatprep.subr.bf16.mxu1 %v1540_v63  ;;  %1479 = vmatpush1.bf16.msra.mxu0 %v1478_v54  ;;  %v1082_v28 = vmin.f32 %v954_v8, 6.0 }
 0x13c   :  { %v957_v14 = vmax.f32 %v811_v5, 0.0  ;;  %v956_v15 = vmax.f32 %v556_v6, 0.0  ;;  %1543 = vmatpush1.bf16.msra.mxu1 %v1542_v58  ;;  %v559_v16 = vpop.f32.mrb[48].mxu0  ;;  %v230_v6 = vpop.permute.xlu1 %229 }
 0x13d   :  { %v1083_v18 = vmin.f32 %v955_v9, 6.0  ;;  %v958_v19 = vmax.f32 %v813_v10, 0.0  ;;  %v560_v20 = vadd.f32 %v559_v16, %v215_v11  ;;  %v816_v21 = vpop.f32.mrb[48].mxu1  ;;  %v561_v22 = vpop.f32.mrb[49].mxu0 }
 0x13e   :  { %v1085_v23 = vmin.f32 %v957_v14, 6.0  ;;  %v1084_v24 = vmin.f32 %v956_v15, 6.0  ;;  %v817_v25 = vadd.f32 %v816_v21, %v215_v11  ;;  %v562_v26 = vadd.f32 %v561_v22, %v215_v11  ;;  %v818_v27 = vpop.f32.mrb[49].mxu1 }
 0x13f   :  { %v1482_v29 = vpack.c.bf16 %v1083_v18, %v1079_v12  ;;  %v1086_v30 = vmin.f32 %v958_v19, 6.0  ;;  %v819_v3 = vadd.f32 %v818_v27, %v215_v11  ;;  %v959_v34 = vmax.f32 %v560_v20, 0.0 }
 0x140   :  { %v1546_v32 = vpack.c.bf16 %v1085_v23, %v1081_v13  ;;  %v1480_v33 = vpack.c.bf16 %v1084_v24, %v1080_v17  ;;  %v961_v35 = vmax.f32 %v817_v25, 0.0  ;;  %v565_v36 = vpop.f32.mrb[50].mxu0  ;;  %v960_v38 = vmax.f32 %v562_v26, 0.0  ;;  %v235_v23 = vpop.permute.xlu0 %234 }
 0x141   :  { %v1544_v37 = vpack.c.bf16 %v1086_v30, %v1082_v28  ;;  %v566_v39 = vadd.f32 %v565_v36, %v220_v31  ;;  %v822_v40 = vpop.f32.mrb[50].mxu1  ;;  %v567_v41 = vpop.f32.mrb[51].mxu0  ;;  %v962_v45 = vmax.f32 %v819_v3, 0.0  ;;  %v1087_v49 = vmin.f32 %v959_v34, 6.0 }
 0x142   :  { %v823_v42 = vadd.f32 %v822_v40, %v220_v31  ;;  %v568_v43 = vadd.f32 %v567_v41, %v220_v31  ;;  %v824_v44 = vpop.f32.mrb[51].mxu1  ;;  %1481 = vmatprep.subr.bf16.mxu0 %v1480_v33  ;;  %v1089_v50 = vmin.f32 %v961_v35, 6.0  ;;  %v1088_v54 = vmin.f32 %v960_v38, 6.0 }
 0x143   :  { %v963_v46 = vmax.f32 %v566_v39, 0.0  ;;  %v825_v47 = vadd.f32 %v824_v44, %v220_v31  ;;  %1545 = vmatprep.subr.bf16.mxu1 %v1544_v37  ;;  %1483 = vmatpush1.bf16.msra.mxu0 %v1482_v29  ;;  %v1090_v1 = vmin.f32 %v962_v45, 6.0 }
 0x144   :  { %v965_v51 = vmax.f32 %v823_v42, 0.0  ;;  %v964_v52 = vmax.f32 %v568_v43, 0.0  ;;  %1547 = vmatpush1.bf16.msra.mxu1 %v1546_v32  ;;  %v571_v53 = vpop.f32.mrb[52].mxu0  ;;  %v240_v43 = vpop.permute.xlu1 %239 }
 0x145   :  { %v1091_v55 = vmin.f32 %v963_v46, 6.0  ;;  %v966_v56 = vmax.f32 %v825_v47, 0.0  ;;  %v572_v57 = vadd.f32 %v571_v53, %v225_v48  ;;  %v828_v58 = vpop.f32.mrb[52].mxu1  ;;  %v573_v59 = vpop.f32.mrb[53].mxu0 }
 0x146   :  { %v1093_v60 = vmin.f32 %v965_v51, 6.0  ;;  %v1092_v61 = vmin.f32 %v964_v52, 6.0  ;;  %v829_v62 = vadd.f32 %v828_v58, %v225_v48  ;;  %v574_v63 = vadd.f32 %v573_v59, %v225_v48  ;;  %v830_v0 = vpop.f32.mrb[53].mxu1 }
 0x147   :  { %v1486_v2 = vpack.c.bf16 %v1091_v55, %v1087_v49  ;;  %v1094_v4 = vmin.f32 %v966_v56, 6.0  ;;  %v831_v5 = vadd.f32 %v830_v0, %v225_v48  ;;  %v967_v9 = vmax.f32 %v572_v57, 0.0 }
 0x148   :  { %v1550_v7 = vpack.c.bf16 %v1093_v60, %v1089_v50  ;;  %v1484_v8 = vpack.c.bf16 %v1092_v61, %v1088_v54  ;;  %v969_v10 = vmax.f32 %v829_v62, 0.0  ;;  %v577_v11 = vpop.f32.mrb[54].mxu0  ;;  %v968_v13 = vmax.f32 %v574_v63, 0.0  ;;  %v245_v60 = vpop.permute.xlu0 %244 }
 0x149   :  { %v1548_v12 = vpack.c.bf16 %v1094_v4, %v1090_v1  ;;  %v578_v14 = vadd.f32 %v577_v11, %v230_v6  ;;  %v834_v15 = vpop.f32.mrb[54].mxu1  ;;  %v579_v16 = vpop.f32.mrb[55].mxu0  ;;  %v970_v20 = vmax.f32 %v831_v5, 0.0  ;;  %v1095_v24 = vmin.f32 %v967_v9, 6.0 }
 0x14a   :  { %v835_v17 = vadd.f32 %v834_v15, %v230_v6  ;;  %v580_v18 = vadd.f32 %v579_v16, %v230_v6  ;;  %v836_v19 = vpop.f32.mrb[55].mxu1  ;;  %1485 = vmatprep.subr.bf16.mxu0 %v1484_v8  ;;  %v1097_v25 = vmin.f32 %v969_v10, 6.0  ;;  %v1096_v29 = vmin.f32 %v968_v13, 6.0 }
 0x14b   :  { %v971_v21 = vmax.f32 %v578_v14, 0.0  ;;  %v837_v22 = vadd.f32 %v836_v19, %v230_v6  ;;  %1549 = vmatprep.subr.bf16.mxu1 %v1548_v12  ;;  %1487 = vmatpush1.bf16.msra.mxu0 %v1486_v2  ;;  %v1098_v39 = vmin.f32 %v970_v20, 6.0 }
 0x14c   :  { %v973_v26 = vmax.f32 %v835_v17, 0.0  ;;  %v972_v27 = vmax.f32 %v580_v18, 0.0  ;;  %1551 = vmatpush1.bf16.msra.mxu1 %v1550_v7  ;;  %v583_v28 = vpop.f32.mrb[56].mxu0  ;;  %v250_v18 = vpop.permute.xlu1 %249 }
 0x14d   :  { %v1099_v30 = vmin.f32 %v971_v21, 6.0  ;;  %v974_v3 = vmax.f32 %v837_v22, 0.0  ;;  %v584_v31 = vadd.f32 %v583_v28, %v235_v23  ;;  %v840_v32 = vpop.f32.mrb[56].mxu1  ;;  %v585_v33 = vpop.f32.mrb[57].mxu0 }
 0x14e   :  { %v1101_v34 = vmin.f32 %v973_v26, 6.0  ;;  %v1100_v35 = vmin.f32 %v972_v27, 6.0  ;;  %v841_v36 = vadd.f32 %v840_v32, %v235_v23  ;;  %v586_v37 = vadd.f32 %v585_v33, %v235_v23  ;;  %v842_v38 = vpop.f32.mrb[57].mxu1 }
 0x14f   :  { %v1490_v40 = vpack.c.bf16 %v1099_v30, %v1095_v24  ;;  %v1102_v41 = vmin.f32 %v974_v3, 6.0  ;;  %v843_v42 = vadd.f32 %v842_v38, %v235_v23  ;;  %v975_v46 = vmax.f32 %v584_v31, 0.0 }
 0x150   :  { %v1554_v44 = vpack.c.bf16 %v1101_v34, %v1097_v25  ;;  %v1488_v45 = vpack.c.bf16 %v1100_v35, %v1096_v29  ;;  %v977_v47 = vmax.f32 %v841_v36, 0.0  ;;  %v589_v48 = vpop.f32.mrb[58].mxu0  ;;  %v976_v50 = vmax.f32 %v586_v37, 0.0 }
 0x151   :  { %v1552_v49 = vpack.c.bf16 %v1102_v41, %v1098_v39  ;;  %v590_v51 = vadd.f32 %v589_v48, %v240_v43  ;;  %v846_v52 = vpop.f32.mrb[58].mxu1  ;;  %v591_v53 = vpop.f32.mrb[59].mxu0  ;;  %v978_v57 = vmax.f32 %v843_v42, 0.0  ;;  %v1103_v61 = vmin.f32 %v975_v46, 6.0 }
 0x152   :  { %v847_v54 = vadd.f32 %v846_v52, %v240_v43  ;;  %v592_v55 = vadd.f32 %v591_v53, %v240_v43  ;;  %v848_v56 = vpop.f32.mrb[59].mxu1  ;;  %1489 = vmatprep.subr.bf16.mxu0 %v1488_v45  ;;  %v1105_v62 = vmin.f32 %v977_v47, 6.0  ;;  %v1104_v2 = vmin.f32 %v976_v50, 6.0  ;;  %v1124_v50 = vpop.permute.xlu0 %1123 }
 0x153   :  { %v979_v58 = vmax.f32 %v590_v51, 0.0  ;;  %v849_v59 = vadd.f32 %v848_v56, %v240_v43  ;;  %1553 = vmatprep.subr.bf16.mxu1 %v1552_v49  ;;  %1491 = vmatpush1.bf16.msra.mxu0 %v1490_v40  ;;  %v1106_v14 = vmin.f32 %v978_v57, 6.0  ;;  %v1593_v49 = vld [vmem:[%s2013_s3] sm:$0xff] }
 0x154   :  { %v981_v63 = vmax.f32 %v847_v54, 0.0  ;;  %v980_v0 = vmax.f32 %v592_v55, 0.0  ;;  %1555 = vmatpush1.bf16.msra.mxu1 %v1554_v44  ;;  %v595_v1 = vpop.f32.mrb[60].mxu0 }
 0x155   :  { %v1107_v4 = vmin.f32 %v979_v58, 6.0  ;;  %v982_v5 = vmax.f32 %v849_v59, 0.0  ;;  %v596_v6 = vadd.f32 %v595_v1, %v245_v60  ;;  %v852_v7 = vpop.f32.mrb[60].mxu1  ;;  %v597_v8 = vpop.f32.mrb[61].mxu0 }
 0x156   :  { %v1109_v9 = vmin.f32 %v981_v63, 6.0  ;;  %v1108_v10 = vmin.f32 %v980_v0, 6.0  ;;  %v853_v11 = vadd.f32 %v852_v7, %v245_v60  ;;  %v598_v12 = vadd.f32 %v597_v8, %v245_v60  ;;  %v854_v13 = vpop.f32.mrb[61].mxu1 }
 0x157   :  { %v1494_v15 = vpack.c.bf16 %v1107_v4, %v1103_v61  ;;  %v1110_v16 = vmin.f32 %v982_v5, 6.0  ;;  %v855_v17 = vadd.f32 %v854_v13, %v245_v60  ;;  %v983_v23 = vmax.f32 %v596_v6, 0.0 }
 0x158   :  { %v1558_v19 = vpack.c.bf16 %v1109_v9, %v1105_v62  ;;  %v1492_v20 = vpack.c.bf16 %v1108_v10, %v1104_v2  ;;  %v601_v21 = vpop.f32.mrb[62].mxu0  ;;  %v985_v27 = vmax.f32 %v853_v11, 0.0  ;;  %v984_v28 = vmax.f32 %v598_v12, 0.0 }
 0x159   :  { %v1556_v22 = vpack.c.bf16 %v1110_v16, %v1106_v14  ;;  %v602_v24 = vadd.f32 %v601_v21, %v250_v18  ;;  %v858_v25 = vpop.f32.mrb[62].mxu1  ;;  %v603_v26 = vpop.f32.mrb[63].mxu0  ;;  %v986_v31 = vmax.f32 %v855_v17, 0.0  ;;  %v1111_v36 = vmin.f32 %v983_v23, 6.0 }
 0x15a   :  { %v859_v29 = vadd.f32 %v858_v25, %v250_v18  ;;  %v604_v30 = vadd.f32 %v603_v26, %v250_v18  ;;  %v860_v3 = vpop.f32.mrb[63].mxu1  ;;  %1493 = vmatprep.subr.bf16.mxu0 %v1492_v20  ;;  %v1113_v39 = vmin.f32 %v985_v27, 6.0  ;;  %v1112_v40 = vmin.f32 %v984_v28, 6.0 }
 0x15b   :  { %v987_v32 = vmax.f32 %v602_v24, 0.0  ;;  %v861_v33 = vadd.f32 %v860_v3, %v250_v18  ;;  %1557 = vmatprep.subr.bf16.mxu1 %v1556_v22  ;;  %1495 = vmatpush1.bf16.msra.mxu0 %v1494_v15  ;;  %v1114_v43 = vmin.f32 %v986_v31, 6.0  ;;  %v1271_v15 = vlaneseq }
 0x15c   :  { %v989_v34 = vmax.f32 %v859_v29, 0.0  ;;  %v988_v35 = vmax.f32 %v604_v30, 0.0  ;;  %1559 = vmatpush1.bf16.msra.mxu1 %v1558_v19 }
 0x15d   :  { %v1115_v37 = vmin.f32 %v987_v32, 6.0  ;;  %v990_v38 = vmax.f32 %v861_v33, 0.0  ;;  %v1272_v20 = vshrl.u32 %v1271_v15, 7 }
 0x15e   :  { %v1117_v41 = vmin.f32 %v989_v34, 6.0  ;;  %v1116_v42 = vmin.f32 %v988_v35, 6.0 }
 0x15f   :  { %v1498_v44 = vpack.c.bf16 %v1115_v37, %v1111_v36  ;;  %v1118_v45 = vmin.f32 %v990_v38, 6.0  ;;  %vm1345_vm1 = vcmp.lt.s32.totalorder %v1272_v20, 2 }
 0x160   :  { %v1562_v46 = vpack.c.bf16 %v1117_v41, %v1113_v39  ;;  %v1496_v47 = vpack.c.bf16 %v1116_v42, %v1112_v40 }
 0x161   :  { %v1560_v48 = vpack.c.bf16 %v1118_v45, %v1114_v43 }
 0x162   :  { %1497 = vmatprep.subr.bf16.mxu0 %v1496_v47 }
 0x163   :  { %1561 = vmatprep.subr.bf16.mxu1 %v1560_v48  ;;  %1499 = vmatpush1.bf16.msra.mxu0 %v1498_v44 }
 0x164   :  { %1563 = vmatpush1.bf16.msra.mxu1 %v1562_v46 }
 0x166   :  { %1194 = vmatmul.mubr.f32.vlgmr.msra.gmra.mrb[64].mxu0 %v1593_v49 }
 0x167   :  { %1265 = vmatmul.mubr.f32.vlgmr.msra.gmra.mrb[64].mxu1 %v1593_v49 }
 0x239   :  { %v1195_v51 = vpop.f32.mrb[64].mxu0 }
 0x23a   :  { %v1979_v52 = vadd.f32 %v1195_v51, %v1124_v50  ;;  %v1266_v53 = vpop.f32.mrb[64].mxu1  ;;  %v1197_v54 = vpop.f32.mrb[65].mxu0 }
 0x23b   :  { %v1981_v55 = vadd.f32 %v1266_v53, %v1124_v50  ;;  %v1983_v56 = vadd.f32 %v1197_v54, %v1124_v50  ;;  %v1268_v57 = vpop.f32.mrb[65].mxu1 }
 0x23c   :  { %v1285_v58 = vand.u32 2147483647, %v1979_v52  ;;  %v1986_v59 = vadd.f32 %v1268_v57, %v1124_v50  ;;  %v1281_v29 = vmax.f32 %v1979_v52, 0.0 }
 0x23d   :  { %v1287_v60 = vand.u32 2147483647, %v1981_v55  ;;  %v1286_v62 = vand.u32 2147483647, %v1983_v56  ;;  %v1283_v30 = vmax.f32 %v1981_v55, 0.0  ;;  %v1282_v34 = vmax.f32 %v1983_v56, 0.0 }
 0x23e   :  { %v1289_v61 = vsub.f32 0.0, %v1285_v58  ;;  %v1288_v0 = vand.u32 2147483647, %v1986_v59  ;;  %v1284_v47 = vmax.f32 %v1986_v59, 0.0 }
 0x23f   :  { %v1291_v63 = vsub.f32 0.0, %v1287_v60  ;;  %v1290_v2 = vsub.f32 0.0, %v1286_v62 }
 0x240   :  { %v1293_v1 = vmul.f32 1.442695, %v1289_v61  ;;  %v1292_v5 = vsub.f32 0.0, %v1288_v0 }
 0x241   :  { %v1297_v4 = vmul.f32 1.442695, %v1291_v63  ;;  %v1295_v6 = vmul.f32 1.442695, %v1290_v2 }
 0x242   :  { %1569 = vpow2.f32 %v1293_v1  ;;  %v1299_v7 = vmul.f32 1.442695, %v1292_v5 }
 0x243   :  { %1571 = vpow2.f32 %v1297_v4 }
 0x244   :  { %1573 = vpow2.f32 %v1295_v6 }
 0x245   :  { %1575 = vpow2.f32 %v1299_v7 }
 0x246   :  { %1577 = vtanh.f32 %v1979_v52 }
 0x24c   :  { %v1570_v8 = vpop.eup %1569 }
 0x24d   :  { %v1572_v9 = vpop.eup %1571  ;;  %v1301_v10 = vadd.f32 1.0, %v1570_v8  ;;  %v1304_v17 = vmul.f32 -0.5, %v1570_v8  ;;  %v1307_v23 = vand.u32 2147483647, %v1570_v8 }
 0x24e   :  { %v1574_v11 = vpop.eup %1573  ;;  %v1319_v12 = vadd.f32 1.0, %v1572_v9  ;;  %v1322_v18 = vmul.f32 -0.5, %v1572_v9  ;;  %v1325_v26 = vand.u32 2147483647, %v1572_v9 }
 0x24f   :  { %v1576_v13 = vpop.eup %1575  ;;  %1579 = vlog2.f32 %v1301_v10  ;;  %v1310_v14 = vadd.f32 1.0, %v1574_v11  ;;  %v1313_v19 = vmul.f32 -0.5, %v1574_v11  ;;  %v1305_v21 = vadd.f32 1.0, %v1304_v17 }
 0x250   :  { %1581 = vlog2.f32 %v1319_v12  ;;  %v1328_v16 = vadd.f32 1.0, %v1576_v13  ;;  %v1331_v22 = vmul.f32 -0.5, %v1576_v13  ;;  %v1323_v24 = vadd.f32 1.0, %v1322_v18  ;;  %v1578_v25 = vpop.eup %1577 }
 0x251   :  { %1583 = vlog2.f32 %v1310_v14  ;;  %v1314_v27 = vadd.f32 1.0, %v1313_v19  ;;  %v1316_v3 = vand.u32 2147483647, %v1574_v11  ;;  %v1306_v33 = vmul.f32 %v1570_v8, %v1305_v21 }
 0x252   :  { %1585 = vtanh.f32 %v1981_v55  ;;  %v1332_v35 = vadd.f32 1.0, %v1331_v22  ;;  %vm1308_vm2 = vcmp.lt.f32.partialorder %v1307_v23, 0.0004427343  ;;  %v1324_v38 = vmul.f32 %v1572_v9, %v1323_v24 }
 0x253   :  { %1587 = vlog2.f32 %v1328_v16  ;;  %v1334_v39 = vand.u32 2147483647, %v1576_v13  ;;  %vm1326_vm3 = vcmp.lt.f32.partialorder %v1325_v26, 0.0004427343  ;;  %v1315_v43 = vmul.f32 %v1574_v11, %v1314_v27 }
 0x254   :  { %1589 = vtanh.f32 %v1983_v56  ;;  %vm1317_vm4 = vcmp.lt.f32.partialorder %v1316_v3, 0.0004427343  ;;  %v1333_v52 = vmul.f32 %v1576_v13, %v1332_v35  ;;  %v1277_v53 = vmul.f32 2.0, %v1578_v25 }
 0x255   :  { %1591 = vtanh.f32 %v1986_v59  ;;  %vm1335_vm5 = vcmp.lt.f32.partialorder %v1334_v39, 0.0004427343 }
 0x259   :  { %v1580_v28 = vpop.eup %1579 }
 0x25a   :  { %v1582_v31 = vpop.eup %1581  ;;  %v1303_v32 = vmul.f32 0.6931472, %v1580_v28 }
 0x25b   :  { %v1584_v36 = vpop.eup %1583  ;;  %v1321_v37 = vmul.f32 0.6931472, %v1582_v31 }
 0x25c   :  { %v1586_v40 = vpop.eup %1585  ;;  %v1309_v41 = vsel %vm1308_vm2, %v1306_v33, %v1303_v32  ;;  %v1312_v42 = vmul.f32 0.6931472, %v1584_v36 }
 0x25d   :  { %v1588_v44 = vpop.eup %1587  ;;  %v1337_v45 = vadd.f32 %v1309_v41, %v1281_v29  ;;  %v1327_v46 = vsel %vm1326_vm3, %v1324_v38, %v1321_v37  ;;  %v1279_v57 = vmul.f32 2.0, %v1586_v40 }
 0x25e   :  { %v1590_v48 = vpop.eup %1589  ;;  %v1339_v49 = vadd.f32 %v1327_v46, %v1283_v30  ;;  %v1318_v50 = vsel %vm1317_vm4, %v1315_v43, %v1312_v42  ;;  %v1330_v51 = vmul.f32 0.6931472, %v1588_v44 }
 0x25f   :  { %v1341_v54 = vadd.f32 0.001, %v1337_v45  ;;  %v1338_v55 = vadd.f32 %v1318_v50, %v1282_v34  ;;  %v1592_v56 = vpop.eup %1591  ;;  %v1278_v62 = vmul.f32 2.0, %v1590_v48 }
 0x260   :  { %v1343_v58 = vadd.f32 0.001, %v1339_v49  ;;  %v1336_v60 = vsel %vm1335_vm5, %v1333_v52, %v1330_v51  ;;  %v1280_v2 = vmul.f32 2.0, %v1592_v56 }
 0x261   :  { %v1346_v61 = vsel %vm1345_vm1, %v1277_v53, %v1341_v54  ;;  %v1342_v63 = vadd.f32 0.001, %v1338_v55  ;;  %v1340_v0 = vadd.f32 %v1336_v60, %v1284_v47 }
 0x262   :  { %v1348_v59 = vsel %vm1345_vm1, %v1279_v57, %v1343_v58 }
 0x263   :  { %v1347_v1 = vsel %vm1345_vm1, %v1278_v62, %v1342_v63  ;;  %v1344_v4 = vadd.f32 0.001, %v1340_v0 }
 0x264   :  { %v1354_v5 = vcombine.low %v1346_v61, %v1347_v1 }
 0x265   :  { %v1349_v6 = vsel %vm1345_vm1, %v1280_v2, %v1344_v4 }
 0x266   :  { %1358 = vst [vmem:[%s2014_s5] sm:$0xff] %v1354_v5  ;;  %v1355_v7 = vcombine.low %v1348_v59, %v1349_v6 }
 0x268   :  { %1359 = vst [vmem:[%s2014_s5 + $0x8] sm:$0xff] %v1355_v7 }

</bundles_post_ra>
